<compile_context>
chip_gen: v6e
topology: v6e:2x2x1
jax: 0.10.0
libtpu: 0.0.40
codegen_flags: <defaults>
</compile_context>

<pallas_src>
import functools

import jax
import jax.numpy as jnp
import numpy as np
from jax import lax
from jax.experimental import pallas as pl
from jax.experimental.pallas import tpu as pltpu


def _interp_matrix_1d(n_in, n_out):
    """Bilinear, align_corners=True interpolation matrix, shape (n_out, n_in)."""
    m = np.zeros((n_out, n_in), np.float32)
    if n_in == 1 or n_out == 1:
        m[:, 0] = 1.0
        return m
    src = np.arange(n_out, dtype=np.float64) * (n_in - 1) / (n_out - 1)
    i0 = np.clip(np.floor(src).astype(np.int64), 0, n_in - 1)
    i1 = np.minimum(i0 + 1, n_in - 1)
    w = (src - i0).astype(np.float32)
    for o in range(n_out):
        m[o, i0[o]] += 1.0 - w[o]
        m[o, i1[o]] += w[o]
    return m


def _fold_bn(w, b, gamma, beta, mean, var, eps):
    scale = gamma / jnp.sqrt(var + eps)
    return w * scale[:, None, None, None], (b - mean) * scale + beta


def _up_kernel(x1_ref, x2_ref, rxT_ref, w1_ref, b1_ref, w2_ref, b2_ref,
               o_ref, cat_ref, mid_ref, *, ry, C1, C2, H1, W1, H2, W2,
               Cmid, dy0, dx0, need_zero_up):
    """Fused Up block for one batch element, channel-first / flat-spatial.

    x1_ref : (1, C1, H1, W1)           low-res features (to be upsampled x2)
    x2_ref : (1, C2, H2*W2)            skip connection, flattened spatial
    rxT_ref: (W1, 2*W1)                1-D width interpolation matrix (transposed)
    w1_ref : (Cmid, 9*(C1+C2))         conv1 weight, BN folded, im2col layout
    b1_ref : (Cmid, 1)                 conv1 folded bias
    w2_ref : (Cout, 9*Cmid)            conv2 weight, BN folded, im2col layout
    b2_ref : (Cout, 1)                 conv2 folded bias
    o_ref  : (1, Cout, H2*W2)          output (lane-dense)
    cat_ref: (Cin, H2*W2 + 2*(W2+1))   flat concat frame with end padding
    mid_ref: (Cmid, H2*W2 + 2*(W2+1))  flat conv1 activation frame
    """
    f32 = jnp.float32
    OH, OW = 2 * H1, 2 * W1
    Cin = C1 + C2
    HW = H2 * W2
    P = W2 + 1   # end padding so every 3x3 tap slice stays in-bounds and zero

    # ---- zero only the padding strips (interior is fully overwritten) ------
    cat_ref[:, 0:P] = jnp.zeros((Cin, P), f32)
    cat_ref[:, P + HW:P + HW + P] = jnp.zeros((Cin, P), f32)
    mid_ref[:, 0:P] = jnp.zeros((Cmid, P), f32)
    mid_ref[:, P + HW:P + HW + P] = jnp.zeros((Cmid, P), f32)
    if need_zero_up:
        # F.pad of the upsampled branch is non-trivial -> pre-zero its region
        cat_ref[C2:Cin, P:P + HW] = jnp.zeros((C1, HW), f32)

    # ---- skip connection goes straight into the frame (lane-dense copy) ----
    cat_ref[0:C2, P:P + HW] = x2_ref[0].astype(f32)

    # ---- bilinear x2 (align_corners=True), separable ------------------------
    # width axis: one MXU matmul; height axis: per-output-row blends whose
    # (<=2) weights are Python constants -> no dense kron operator at all.
    x1 = x1_ref[0].astype(f32).reshape(C1 * H1, W1)
    tw = jnp.dot(x1, rxT_ref[...], preferred_element_type=f32)   # (C1*H1, OW)
    tw = tw.reshape(C1, H1, OW)
    for yo in range(OH):
        taps = [(int(h), float(ry[yo, h])) for h in np.nonzero(ry[yo])[0]]
        h0, w0 = taps[0]
        row = tw[:, h0, :] if w0 == 1.0 else w0 * tw[:, h0, :]
        for h, w in taps[1:]:
            row = row + w * tw[:, h, :]
        start = P + (yo + dy0) * W2 + dx0
        cat_ref[C2:Cin, start:start + OW] = row

    # ---- im2col: 9 lane-shifted slices of the flat frame + column masks ----
    col = lax.broadcasted_iota(jnp.int32, (1, HW), 1) % W2
    not_left = col >= 1            # tap dx=-1 must not read previous row's tail
    not_right = col < (W2 - 1)     # tap dx=+1 must not read next row's head

    def im2col(frame_ref):
        pieces = []
        for ky in range(3):
            for kx in range(3):
                s = (ky - 1) * W2 + (kx - 1)
                piece = frame_ref[:, P + s:P + s + HW]
                if kx == 0:
                    piece = jnp.where(not_left, piece, 0.0)
                elif kx == 2:
                    piece = jnp.where(not_right, piece, 0.0)
                pieces.append(piece)
        return jnp.concatenate(pieces, axis=0)        # (9*C, HW)

    # ---- conv1 (3x3, pad=1) + folded BN + ReLU: ONE matmul, K = 9*Cin ------
    y1 = jnp.dot(w1_ref[...], im2col(cat_ref),
                 preferred_element_type=f32) + b1_ref[...]
    y1 = jnp.maximum(y1, 0.0)                         # (Cmid, HW)
    mid_ref[:, P:P + HW] = y1                         # stays in VMEM only

    # ---- conv2 (3x3, pad=1) + folded BN + ReLU: ONE matmul, K = 9*Cmid -----
    y2 = jnp.dot(w2_ref[...], im2col(mid_ref),
                 preferred_element_type=f32) + b2_ref[...]
    y2 = jnp.maximum(y2, 0.0)                         # (Cout, HW)
    o_ref[0] = y2.astype(o_ref.dtype)                 # lane-dense store


def up_forward_pallas(x1, x2, params):
    """Up.forward(x1, x2) (bilinear=True, eval-mode BN). NCHW in / NCHW out."""
    N, C1, H1, W1 = x1.shape
    N2, C2, H2, W2 = x2.shape
    assert N == N2
    OH, OW = 2 * H1, 2 * W1
    diffY, diffX = H2 - OH, W2 - OW
    assert diffY >= 0 and diffX >= 0

    Cin = C1 + C2
    Cmid = params["conv1_w"].shape[0]
    Cout = params["conv2_w"].shape[0]
    HW = H2 * W2
    eps = params["eps"]

    # fold eval-mode BN into the convs; im2col weight layout (Cout, 9*Cin)
    w1f, b1f = _fold_bn(params["conv1_w"], params["conv1_b"], params["bn1_g"],
                        params["bn1_b"], params["bn1_m"], params["bn1_v"], eps)
    w2f, b2f = _fold_bn(params["conv2_w"], params["conv2_b"], params["bn2_g"],
                        params["bn2_b"], params["bn2_m"], params["bn2_v"], eps)
    w1m = jnp.transpose(w1f, (0, 2, 3, 1)).reshape(Cmid, 9 * Cin)
    w2m = jnp.transpose(w2f, (0, 2, 3, 1)).reshape(Cout, 9 * Cmid)
    b1m = b1f.reshape(Cmid, 1).astype(jnp.float32)
    b2m = b2f.reshape(Cout, 1).astype(jnp.float32)

    # separable bilinear operators (tiny); the height one is baked in as
    # Python constants, the width one is a (W1, OW) matmul operand.
    ry = _interp_matrix_1d(H1, OH)                      # numpy, trace-time
    rxT = jnp.asarray(_interp_matrix_1d(W1, OW).T)      # (W1, OW)

    # flatten spatial of x2 / output so the in-kernel lane dim is H2*W2
    x2f = x2.reshape(N, C2, HW)

    kernel = functools.partial(
        _up_kernel, ry=ry, C1=C1, C2=C2, H1=H1, W1=W1, H2=H2, W2=W2,
        Cmid=Cmid, dy0=diffY // 2, dx0=diffX // 2,
        need_zero_up=(diffY > 0 or diffX > 0))

    # Grid over batch, "parallel" (feeds both v7x TCs for even N).  On
    # single-TC v5e/v6e the batch could additionally be folded into the lane
    # dim (one step, M = N*H2*W2); kept per-image here for simplicity.
    out_flat = pl.pallas_call(
        kernel,
        out_shape=jax.ShapeDtypeStruct((N, Cout, HW), x2.dtype),
        grid_spec=pltpu.PrefetchScalarGridSpec(
            num_scalar_prefetch=0,
            grid=(N,),
            in_specs=[
                pl.BlockSpec((1, C1, H1, W1), lambda n: (n, 0, 0, 0)),
                pl.BlockSpec((1, C2, HW), lambda n: (n, 0, 0)),
                pl.BlockSpec((W1, OW), lambda n: (0, 0)),
                pl.BlockSpec((Cmid, 9 * Cin), lambda n: (0, 0)),
                pl.BlockSpec((Cmid, 1), lambda n: (0, 0)),
                pl.BlockSpec((Cout, 9 * Cmid), lambda n: (0, 0)),
                pl.BlockSpec((Cout, 1), lambda n: (0, 0)),
            ],
            out_specs=pl.BlockSpec((1, Cout, HW), lambda n: (n, 0, 0)),
            scratch_shapes=[
                pltpu.VMEM((Cin, HW + 2 * (W2 + 1)), jnp.float32),
                pltpu.VMEM((Cmid, HW + 2 * (W2 + 1)), jnp.float32),
            ]),
        compiler_params=pltpu.CompilerParams(
            dimension_semantics=("parallel",)),
    )(x1, x2f, rxT, w1m, b1m, w2m, b2m)

    return out_flat.reshape(N, Cout, H2, W2)


# ---------------------------- pure-JAX reference -----------------------------
def _bilinear_up2_ref(x):
    """nn.Upsample(scale_factor=2, mode='bilinear', align_corners=True), NCHW."""
    N, C, H, W = x.shape
    OH, OW = 2 * H, 2 * W
    ys = jnp.linspace(0.0, H - 1.0, OH)
    xs = jnp.linspace(0.0, W - 1.0, OW)
    y0 = jnp.clip(jnp.floor(ys).astype(jnp.int32), 0, H - 1)
    x0 = jnp.clip(jnp.floor(xs).astype(jnp.int32), 0, W - 1)
    y1 = jnp.minimum(y0 + 1, H - 1)
    x1 = jnp.minimum(x0 + 1, W - 1)
    wy = (ys - y0)[None, None, :, None]
    wx = (xs - x0)[None, None, None, :]
    rows = x[:, :, y0, :] * (1.0 - wy) + x[:, :, y1, :] * wy
    return rows[:, :, :, x0] * (1.0 - wx) + rows[:, :, :, x1] * wx


def _reference(x1, x2, p):
    eps = p["eps"]
    x1u = _bilinear_up2_ref(x1)
    diffY = x2.shape[2] - x1u.shape[2]
    diffX = x2.shape[3] - x1u.shape[3]
    x1u = jnp.pad(x1u, ((0, 0), (0, 0),
                        (diffY // 2, diffY - diffY // 2),
                        (diffX // 2, diffX - diffX // 2)))
    x = jnp.concatenate([x2, x1u], axis=1)

    def conv_bn_relu(x, w, b, g, beta, m, v):
        y = lax.conv_general_dilated(
            x, w, window_strides=(1, 1), padding=[(1, 1), (1, 1)],
            dimension_numbers=("NCHW", "OIHW", "NCHW"),
            precision=lax.Precision.HIGHEST)
        y = y + b[None, :, None, None]
        y = (y - m[None, :, None, None]) * (
            g[None, :, None, None] / jnp.sqrt(v[None, :, None, None] + eps)
        ) + beta[None, :, None, None]
        return jnp.maximum(y, 0.0)

    y = conv_bn_relu(x, p["conv1_w"], p["conv1_b"], p["bn1_g"], p["bn1_b"],
                     p["bn1_m"], p["bn1_v"])
    y = conv_bn_relu(y, p["conv2_w"], p["conv2_b"], p["bn2_g"], p["bn2_b"],
                     p["bn2_m"], p["bn2_v"])
    return y


if __name__ == "__main__":
    # Up(in_channels=8, out_channels=4, bilinear=True):
    #   x1: (2, 4, 8, 8)   deep features (upsampled x2 inside the block)
    #   x2: (2, 4, 16, 16) skip connection; concat -> 8 ch, DoubleConv(8,4,mid=4)
    N = 2
    C1 = C2 = 4
    Cin, Cmid, Cout = C1 + C2, 4, 4
    H1 = W1 = 8
    H2 = W2 = 16

    key = jax.random.PRNGKey(0)
    ks = jax.random.split(key, 16)
    x1 = jax.random.normal(ks[0], (N, C1, H1, W1), jnp.float32)
    x2 = jax.random.normal(ks[1], (N, C2, H2, W2), jnp.float32)

    params = dict(
        conv1_w=0.2 * jax.random.normal(ks[2], (Cmid, Cin, 3, 3), jnp.float32),
        conv1_b=0.1 * jax.random.normal(ks[3], (Cmid,), jnp.float32),
        bn1_g=1.0 + 0.1 * jax.random.normal(ks[4], (Cmid,), jnp.float32),
        bn1_b=0.1 * jax.random.normal(ks[5], (Cmid,), jnp.float32),
        bn1_m=0.1 * jax.random.normal(ks[6], (Cmid,), jnp.float32),
        bn1_v=0.5 + jax.random.uniform(ks[7], (Cmid,), jnp.float32),
        conv2_w=0.2 * jax.random.normal(ks[8], (Cout, Cmid, 3, 3), jnp.float32),
        conv2_b=0.1 * jax.random.normal(ks[9], (Cout,), jnp.float32),
        bn2_g=1.0 + 0.1 * jax.random.normal(ks[10], (Cout,), jnp.float32),
        bn2_b=0.1 * jax.random.normal(ks[11], (Cout,), jnp.float32),
        bn2_m=0.1 * jax.random.normal(ks[12], (Cout,), jnp.float32),
        bn2_v=0.5 + jax.random.uniform(ks[13], (Cout,), jnp.float32),
        eps=1e-5,
    )

    out = jax.block_until_ready(up_forward_pallas(x1, x2, params))
    ref = jax.block_until_ready(_reference(x1, x2, params))

    assert out.shape == (N, Cout, H2, W2), out.shape
    np.testing.assert_allclose(np.asarray(out), np.asarray(ref),
                               atol=2e-2, rtol=2e-2)
    print("KERNEL_OK")
</pallas_src>

<mosaic_0001>
module attributes {stable_mosaic.version = 11 : i64} {
  func.func @_up_kernel(%arg0: i32, %arg1: memref<1x4x8x8xf32, #tpu.memory_space<vmem>>, %arg2: memref<1x4x256xf32, #tpu.memory_space<vmem>>, %arg3: memref<8x16xf32, #tpu.memory_space<vmem>>, %arg4: memref<4x72xf32, #tpu.memory_space<vmem>>, %arg5: memref<4x1xf32, #tpu.memory_space<vmem>>, %arg6: memref<4x36xf32, #tpu.memory_space<vmem>>, %arg7: memref<4x1xf32, #tpu.memory_space<vmem>>, %arg8: memref<1x4x256xf32, #tpu.memory_space<vmem>>, %arg9: memref<8x290xf32, #tpu.memory_space<vmem>>, %arg10: memref<4x290xf32, #tpu.memory_space<vmem>>) attributes {dimension_semantics = [#tpu.dimension_semantics<parallel>], iteration_bounds = array<i64: 2>, scalar_prefetch = 0 : i64, scratch_operands = 2 : i64, tpu.core_type = #tpu.core_type<tc>, window_params = [{transform_indices = @transform_0, window_bounds = array<i64: 1, 4, 8, 8>}, {transform_indices = @transform_1, window_bounds = array<i64: 1, 4, 256>}, {pipeline_mode = #tpu.pipeline_mode<synchronous>, transform_indices = @transform_2, window_bounds = array<i64: 8, 16>}, {pipeline_mode = #tpu.pipeline_mode<synchronous>, transform_indices = @transform_3, window_bounds = array<i64: 4, 72>}, {pipeline_mode = #tpu.pipeline_mode<synchronous>, transform_indices = @transform_4, window_bounds = array<i64: 4, 1>}, {pipeline_mode = #tpu.pipeline_mode<synchronous>, transform_indices = @transform_5, window_bounds = array<i64: 4, 36>}, {pipeline_mode = #tpu.pipeline_mode<synchronous>, transform_indices = @transform_6, window_bounds = array<i64: 4, 1>}, {transform_indices = @transform_7, window_bounds = array<i64: 1, 4, 256>}]} {
    %cst = arith.constant 0.000000e+00 : f32
    %0 = vector.broadcast %cst : f32 to vector<8x17xf32>
    %c0 = arith.constant 0 : index
    %c0_0 = arith.constant 0 : index
    %1 = vector.load %arg9[%c0, %c0_0] : memref<8x290xf32, #tpu.memory_space<vmem>>, vector<8x17xf32>
    tpu.vector_store %arg9[%c0, %c0_0], %0 {strides = array<i32>} : memref<8x290xf32, #tpu.memory_space<vmem>>, vector<8x17xf32>,
    %cst_1 = arith.constant 0.000000e+00 : f32
    %2 = vector.broadcast %cst_1 : f32 to vector<8x17xf32>
    %c0_2 = arith.constant 0 : index
    %c273 = arith.constant 273 : index
    %3 = vector.load %arg9[%c0_2, %c273] : memref<8x290xf32, #tpu.memory_space<vmem>>, vector<8x17xf32>
    tpu.vector_store %arg9[%c0_2, %c273], %2 {strides = array<i32>} : memref<8x290xf32, #tpu.memory_space<vmem>>, vector<8x17xf32>,
    %cst_3 = arith.constant 0.000000e+00 : f32
    %4 = vector.broadcast %cst_3 : f32 to vector<4x17xf32>
    %c0_4 = arith.constant 0 : index
    %c0_5 = arith.constant 0 : index
    %5 = vector.load %arg10[%c0_4, %c0_5] : memref<4x290xf32, #tpu.memory_space<vmem>>, vector<4x17xf32>
    tpu.vector_store %arg10[%c0_4, %c0_5], %4 {strides = array<i32>} : memref<4x290xf32, #tpu.memory_space<vmem>>, vector<4x17xf32>,
    %cst_6 = arith.constant 0.000000e+00 : f32
    %6 = vector.broadcast %cst_6 : f32 to vector<4x17xf32>
    %c0_7 = arith.constant 0 : index
    %c273_8 = arith.constant 273 : index
    %7 = vector.load %arg10[%c0_7, %c273_8] : memref<4x290xf32, #tpu.memory_space<vmem>>, vector<4x17xf32>
    tpu.vector_store %arg10[%c0_7, %c273_8], %6 {strides = array<i32>} : memref<4x290xf32, #tpu.memory_space<vmem>>, vector<4x17xf32>,
    %c0_9 = arith.constant 0 : index
    %c0_10 = arith.constant 0 : index
    %c0_11 = arith.constant 0 : index
    %8 = vector.load %arg2[%c0_9, %c0_10, %c0_11] : memref<1x4x256xf32, #tpu.memory_space<vmem>>, vector<1x4x256xf32>
    %9 = vector.shape_cast %8 : vector<1x4x256xf32> to vector<4x256xf32>
    %c0_12 = arith.constant 0 : index
    %c17 = arith.constant 17 : index
    %10 = vector.load %arg9[%c0_12, %c17] : memref<8x290xf32, #tpu.memory_space<vmem>>, vector<4x256xf32>
    tpu.vector_store %arg9[%c0_12, %c17], %9 {strides = array<i32>} : memref<8x290xf32, #tpu.memory_space<vmem>>, vector<4x256xf32>,
    %c0_13 = arith.constant 0 : index
    %c0_14 = arith.constant 0 : index
    %c0_15 = arith.constant 0 : index
    %c0_16 = arith.constant 0 : index
    %11 = vector.load %arg1[%c0_13, %c0_14, %c0_15, %c0_16] : memref<1x4x8x8xf32, #tpu.memory_space<vmem>>, vector<1x4x8x8xf32>
    %12 = vector.shape_cast %11 : vector<1x4x8x8xf32> to vector<4x8x8xf32>
    %13 = vector.shape_cast %12 : vector<4x8x8xf32> to vector<32x8xf32>
    %c0_17 = arith.constant 0 : index
    %c0_18 = arith.constant 0 : index
    %14 = vector.load %arg3[%c0_17, %c0_18] : memref<8x16xf32, #tpu.memory_space<vmem>>, vector<8x16xf32>
    %cst_19 = arith.constant dense<0.000000e+00> : vector<32x16xf32>
    %15 = tpu.matmul %13, %14, %cst_19 {dimension_numbers = #tpu.dot_dimension_numbers<[1], [0], [0], [1], [0, 0, 1, 1], [], []>} : vector<32x8xf32>, vector<8x16xf32>, vector<32x16xf32> -> vector<32x16xf32>
    %16 = vector.shape_cast %15 : vector<32x16xf32> to vector<4x8x16xf32>
    %17 = vector.extract_strided_slice %16 {offsets = [0, 0, 0], sizes = [4, 1, 16], strides = [1, 1, 1]} : vector<4x8x16xf32> to vector<4x1x16xf32>
    %18 = vector.shape_cast %17 : vector<4x1x16xf32> to vector<4x16xf32>
    %c4 = arith.constant 4 : index
    %c17_20 = arith.constant 17 : index
    %19 = vector.load %arg9[%c4, %c17_20] : memref<8x290xf32, #tpu.memory_space<vmem>>, vector<4x16xf32>
    tpu.vector_store %arg9[%c4, %c17_20], %18 {strides = array<i32>} : memref<8x290xf32, #tpu.memory_space<vmem>>, vector<4x16xf32>,
    %20 = vector.extract_strided_slice %16 {offsets = [0, 0, 0], sizes = [4, 1, 16], strides = [1, 1, 1]} : vector<4x8x16xf32> to vector<4x1x16xf32>
    %21 = vector.shape_cast %20 : vector<4x1x16xf32> to vector<4x16xf32>
    %cst_21 = arith.constant 0.533333302 : f32
    %22 = vector.broadcast %cst_21 : f32 to vector<4x16xf32>
    %23 = arith.mulf %22, %21 : vector<4x16xf32>
    %24 = vector.extract_strided_slice %16 {offsets = [0, 1, 0], sizes = [4, 1, 16], strides = [1, 1, 1]} : vector<4x8x16xf32> to vector<4x1x16xf32>
    %25 = vector.shape_cast %24 : vector<4x1x16xf32> to vector<4x16xf32>
    %cst_22 = arith.constant 0.466666669 : f32
    %26 = vector.broadcast %cst_22 : f32 to vector<4x16xf32>
    %27 = arith.mulf %26, %25 : vector<4x16xf32>
    %28 = arith.addf %23, %27 : vector<4x16xf32>
    %c4_23 = arith.constant 4 : index
    %c33 = arith.constant 33 : index
    %29 = vector.load %arg9[%c4_23, %c33] : memref<8x290xf32, #tpu.memory_space<vmem>>, vector<4x16xf32>
    tpu.vector_store %arg9[%c4_23, %c33], %28 {strides = array<i32>} : memref<8x290xf32, #tpu.memory_space<vmem>>, vector<4x16xf32>,
    %30 = vector.extract_strided_slice %16 {offsets = [0, 0, 0], sizes = [4, 1, 16], strides = [1, 1, 1]} : vector<4x8x16xf32> to vector<4x1x16xf32>
    %31 = vector.shape_cast %30 : vector<4x1x16xf32> to vector<4x16xf32>
    %cst_24 = arith.constant 0.0666666627 : f32
    %32 = vector.broadcast %cst_24 : f32 to vector<4x16xf32>
    %33 = arith.mulf %32, %31 : vector<4x16xf32>
    %34 = vector.extract_strided_slice %16 {offsets = [0, 1, 0], sizes = [4, 1, 16], strides = [1, 1, 1]} : vector<4x8x16xf32> to vector<4x1x16xf32>
    %35 = vector.shape_cast %34 : vector<4x1x16xf32> to vector<4x16xf32>
    %cst_25 = arith.constant 0.933333337 : f32
    %36 = vector.broadcast %cst_25 : f32 to vector<4x16xf32>
    %37 = arith.mulf %36, %35 : vector<4x16xf32>
    %38 = arith.addf %33, %37 : vector<4x16xf32>
    %c4_26 = arith.constant 4 : index
    %c49 = arith.constant 49 : index
    %39 = vector.load %arg9[%c4_26, %c49] : memref<8x290xf32, #tpu.memory_space<vmem>>, vector<4x16xf32>
    tpu.vector_store %arg9[%c4_26, %c49], %38 {strides = array<i32>} : memref<8x290xf32, #tpu.memory_space<vmem>>, vector<4x16xf32>,
    %40 = vector.extract_strided_slice %16 {offsets = [0, 1, 0], sizes = [4, 1, 16], strides = [1, 1, 1]} : vector<4x8x16xf32> to vector<4x1x16xf32>
    %41 = vector.shape_cast %40 : vector<4x1x16xf32> to vector<4x16xf32>
    %cst_27 = arith.constant 6.000000e-01 : f32
    %42 = vector.broadcast %cst_27 : f32 to vector<4x16xf32>
    %43 = arith.mulf %42, %41 : vector<4x16xf32>
    %44 = vector.extract_strided_slice %16 {offsets = [0, 2, 0], sizes = [4, 1, 16], strides = [1, 1, 1]} : vector<4x8x16xf32> to vector<4x1x16xf32>
    %45 = vector.shape_cast %44 : vector<4x1x16xf32> to vector<4x16xf32>
    %cst_28 = arith.constant 4.000000e-01 : f32
    %46 = vector.broadcast %cst_28 : f32 to vector<4x16xf32>
    %47 = arith.mulf %46, %45 : vector<4x16xf32>
    %48 = arith.addf %43, %47 : vector<4x16xf32>
    %c4_29 = arith.constant 4 : index
    %c65 = arith.constant 65 : index
    %49 = vector.load %arg9[%c4_29, %c65] : memref<8x290xf32, #tpu.memory_space<vmem>>, vector<4x16xf32>
    tpu.vector_store %arg9[%c4_29, %c65], %48 {strides = array<i32>} : memref<8x290xf32, #tpu.memory_space<vmem>>, vector<4x16xf32>,
    %50 = vector.extract_strided_slice %16 {offsets = [0, 1, 0], sizes = [4, 1, 16], strides = [1, 1, 1]} : vector<4x8x16xf32> to vector<4x1x16xf32>
    %51 = vector.shape_cast %50 : vector<4x1x16xf32> to vector<4x16xf32>
    %cst_30 = arith.constant 0.133333325 : f32
    %52 = vector.broadcast %cst_30 : f32 to vector<4x16xf32>
    %53 = arith.mulf %52, %51 : vector<4x16xf32>
    %54 = vector.extract_strided_slice %16 {offsets = [0, 2, 0], sizes = [4, 1, 16], strides = [1, 1, 1]} : vector<4x8x16xf32> to vector<4x1x16xf32>
    %55 = vector.shape_cast %54 : vector<4x1x16xf32> to vector<4x16xf32>
    %cst_31 = arith.constant 0.866666674 : f32
    %56 = vector.broadcast %cst_31 : f32 to vector<4x16xf32>
    %57 = arith.mulf %56, %55 : vector<4x16xf32>
    %58 = arith.addf %53, %57 : vector<4x16xf32>
    %c4_32 = arith.constant 4 : index
    %c81 = arith.constant 81 : index
    %59 = vector.load %arg9[%c4_32, %c81] : memref<8x290xf32, #tpu.memory_space<vmem>>, vector<4x16xf32>
    tpu.vector_store %arg9[%c4_32, %c81], %58 {strides = array<i32>} : memref<8x290xf32, #tpu.memory_space<vmem>>, vector<4x16xf32>,
    %60 = vector.extract_strided_slice %16 {offsets = [0, 2, 0], sizes = [4, 1, 16], strides = [1, 1, 1]} : vector<4x8x16xf32> to vector<4x1x16xf32>
    %61 = vector.shape_cast %60 : vector<4x1x16xf32> to vector<4x16xf32>
    %cst_33 = arith.constant 0.666666627 : f32
    %62 = vector.broadcast %cst_33 : f32 to vector<4x16xf32>
    %63 = arith.mulf %62, %61 : vector<4x16xf32>
    %64 = vector.extract_strided_slice %16 {offsets = [0, 3, 0], sizes = [4, 1, 16], strides = [1, 1, 1]} : vector<4x8x16xf32> to vector<4x1x16xf32>
    %65 = vector.shape_cast %64 : vector<4x1x16xf32> to vector<4x16xf32>
    %cst_34 = arith.constant 0.333333343 : f32
    %66 = vector.broadcast %cst_34 : f32 to vector<4x16xf32>
    %67 = arith.mulf %66, %65 : vector<4x16xf32>
    %68 = arith.addf %63, %67 : vector<4x16xf32>
    %c4_35 = arith.constant 4 : index
    %c97 = arith.constant 97 : index
    %69 = vector.load %arg9[%c4_35, %c97] : memref<8x290xf32, #tpu.memory_space<vmem>>, vector<4x16xf32>
    tpu.vector_store %arg9[%c4_35, %c97], %68 {strides = array<i32>} : memref<8x290xf32, #tpu.memory_space<vmem>>, vector<4x16xf32>,
    %70 = vector.extract_strided_slice %16 {offsets = [0, 2, 0], sizes = [4, 1, 16], strides = [1, 1, 1]} : vector<4x8x16xf32> to vector<4x1x16xf32>
    %71 = vector.shape_cast %70 : vector<4x1x16xf32> to vector<4x16xf32>
    %cst_36 = arith.constant 0.199999988 : f32
    %72 = vector.broadcast %cst_36 : f32 to vector<4x16xf32>
    %73 = arith.mulf %72, %71 : vector<4x16xf32>
    %74 = vector.extract_strided_slice %16 {offsets = [0, 3, 0], sizes = [4, 1, 16], strides = [1, 1, 1]} : vector<4x8x16xf32> to vector<4x1x16xf32>
    %75 = vector.shape_cast %74 : vector<4x1x16xf32> to vector<4x16xf32>
    %cst_37 = arith.constant 8.000000e-01 : f32
    %76 = vector.broadcast %cst_37 : f32 to vector<4x16xf32>
    %77 = arith.mulf %76, %75 : vector<4x16xf32>
    %78 = arith.addf %73, %77 : vector<4x16xf32>
    %c4_38 = arith.constant 4 : index
    %c113 = arith.constant 113 : index
    %79 = vector.load %arg9[%c4_38, %c113] : memref<8x290xf32, #tpu.memory_space<vmem>>, vector<4x16xf32>
    tpu.vector_store %arg9[%c4_38, %c113], %78 {strides = array<i32>} : memref<8x290xf32, #tpu.memory_space<vmem>>, vector<4x16xf32>,
    %80 = vector.extract_strided_slice %16 {offsets = [0, 3, 0], sizes = [4, 1, 16], strides = [1, 1, 1]} : vector<4x8x16xf32> to vector<4x1x16xf32>
    %81 = vector.shape_cast %80 : vector<4x1x16xf32> to vector<4x16xf32>
    %cst_39 = arith.constant 0.733333349 : f32
    %82 = vector.broadcast %cst_39 : f32 to vector<4x16xf32>
    %83 = arith.mulf %82, %81 : vector<4x16xf32>
    %84 = vector.extract_strided_slice %16 {offsets = [0, 4, 0], sizes = [4, 1, 16], strides = [1, 1, 1]} : vector<4x8x16xf32> to vector<4x1x16xf32>
    %85 = vector.shape_cast %84 : vector<4x1x16xf32> to vector<4x16xf32>
    %cst_40 = arith.constant 0.266666681 : f32
    %86 = vector.broadcast %cst_40 : f32 to vector<4x16xf32>
    %87 = arith.mulf %86, %85 : vector<4x16xf32>
    %88 = arith.addf %83, %87 : vector<4x16xf32>
    %c4_41 = arith.constant 4 : index
    %c129 = arith.constant 129 : index
    %89 = vector.load %arg9[%c4_41, %c129] : memref<8x290xf32, #tpu.memory_space<vmem>>, vector<4x16xf32>
    tpu.vector_store %arg9[%c4_41, %c129], %88 {strides = array<i32>} : memref<8x290xf32, #tpu.memory_space<vmem>>, vector<4x16xf32>,
    %90 = vector.extract_strided_slice %16 {offsets = [0, 3, 0], sizes = [4, 1, 16], strides = [1, 1, 1]} : vector<4x8x16xf32> to vector<4x1x16xf32>
    %91 = vector.shape_cast %90 : vector<4x1x16xf32> to vector<4x16xf32>
    %cst_42 = arith.constant 0.266666651 : f32
    %92 = vector.broadcast %cst_42 : f32 to vector<4x16xf32>
    %93 = arith.mulf %92, %91 : vector<4x16xf32>
    %94 = vector.extract_strided_slice %16 {offsets = [0, 4, 0], sizes = [4, 1, 16], strides = [1, 1, 1]} : vector<4x8x16xf32> to vector<4x1x16xf32>
    %95 = vector.shape_cast %94 : vector<4x1x16xf32> to vector<4x16xf32>
    %cst_43 = arith.constant 0.733333349 : f32
    %96 = vector.broadcast %cst_43 : f32 to vector<4x16xf32>
    %97 = arith.mulf %96, %95 : vector<4x16xf32>
    %98 = arith.addf %93, %97 : vector<4x16xf32>
    %c4_44 = arith.constant 4 : index
    %c145 = arith.constant 145 : index
    %99 = vector.load %arg9[%c4_44, %c145] : memref<8x290xf32, #tpu.memory_space<vmem>>, vector<4x16xf32>
    tpu.vector_store %arg9[%c4_44, %c145], %98 {strides = array<i32>} : memref<8x290xf32, #tpu.memory_space<vmem>>, vector<4x16xf32>,
    %100 = vector.extract_strided_slice %16 {offsets = [0, 4, 0], sizes = [4, 1, 16], strides = [1, 1, 1]} : vector<4x8x16xf32> to vector<4x1x16xf32>
    %101 = vector.shape_cast %100 : vector<4x1x16xf32> to vector<4x16xf32>
    %cst_45 = arith.constant 8.000000e-01 : f32
    %102 = vector.broadcast %cst_45 : f32 to vector<4x16xf32>
    %103 = arith.mulf %102, %101 : vector<4x16xf32>
    %104 = vector.extract_strided_slice %16 {offsets = [0, 5, 0], sizes = [4, 1, 16], strides = [1, 1, 1]} : vector<4x8x16xf32> to vector<4x1x16xf32>
    %105 = vector.shape_cast %104 : vector<4x1x16xf32> to vector<4x16xf32>
    %cst_46 = arith.constant 2.000000e-01 : f32
    %106 = vector.broadcast %cst_46 : f32 to vector<4x16xf32>
    %107 = arith.mulf %106, %105 : vector<4x16xf32>
    %108 = arith.addf %103, %107 : vector<4x16xf32>
    %c4_47 = arith.constant 4 : index
    %c161 = arith.constant 161 : index
    %109 = vector.load %arg9[%c4_47, %c161] : memref<8x290xf32, #tpu.memory_space<vmem>>, vector<4x16xf32>
    tpu.vector_store %arg9[%c4_47, %c161], %108 {strides = array<i32>} : memref<8x290xf32, #tpu.memory_space<vmem>>, vector<4x16xf32>,
    %110 = vector.extract_strided_slice %16 {offsets = [0, 4, 0], sizes = [4, 1, 16], strides = [1, 1, 1]} : vector<4x8x16xf32> to vector<4x1x16xf32>
    %111 = vector.shape_cast %110 : vector<4x1x16xf32> to vector<4x16xf32>
    %cst_48 = arith.constant 0.333333313 : f32
    %112 = vector.broadcast %cst_48 : f32 to vector<4x16xf32>
    %113 = arith.mulf %112, %111 : vector<4x16xf32>
    %114 = vector.extract_strided_slice %16 {offsets = [0, 5, 0], sizes = [4, 1, 16], strides = [1, 1, 1]} : vector<4x8x16xf32> to vector<4x1x16xf32>
    %115 = vector.shape_cast %114 : vector<4x1x16xf32> to vector<4x16xf32>
    %cst_49 = arith.constant 0.666666686 : f32
    %116 = vector.broadcast %cst_49 : f32 to vector<4x16xf32>
    %117 = arith.mulf %116, %115 : vector<4x16xf32>
    %118 = arith.addf %113, %117 : vector<4x16xf32>
    %c4_50 = arith.constant 4 : index
    %c177 = arith.constant 177 : index
    %119 = vector.load %arg9[%c4_50, %c177] : memref<8x290xf32, #tpu.memory_space<vmem>>, vector<4x16xf32>
    tpu.vector_store %arg9[%c4_50, %c177], %118 {strides = array<i32>} : memref<8x290xf32, #tpu.memory_space<vmem>>, vector<4x16xf32>,
    %120 = vector.extract_strided_slice %16 {offsets = [0, 5, 0], sizes = [4, 1, 16], strides = [1, 1, 1]} : vector<4x8x16xf32> to vector<4x1x16xf32>
    %121 = vector.shape_cast %120 : vector<4x1x16xf32> to vector<4x16xf32>
    %cst_51 = arith.constant 0.866666674 : f32
    %122 = vector.broadcast %cst_51 : f32 to vector<4x16xf32>
    %123 = arith.mulf %122, %121 : vector<4x16xf32>
    %124 = vector.extract_strided_slice %16 {offsets = [0, 6, 0], sizes = [4, 1, 16], strides = [1, 1, 1]} : vector<4x8x16xf32> to vector<4x1x16xf32>
    %125 = vector.shape_cast %124 : vector<4x1x16xf32> to vector<4x16xf32>
    %cst_52 = arith.constant 0.13333334 : f32
    %126 = vector.broadcast %cst_52 : f32 to vector<4x16xf32>
    %127 = arith.mulf %126, %125 : vector<4x16xf32>
    %128 = arith.addf %123, %127 : vector<4x16xf32>
    %c4_53 = arith.constant 4 : index
    %c193 = arith.constant 193 : index
    %129 = vector.load %arg9[%c4_53, %c193] : memref<8x290xf32, #tpu.memory_space<vmem>>, vector<4x16xf32>
    tpu.vector_store %arg9[%c4_53, %c193], %128 {strides = array<i32>} : memref<8x290xf32, #tpu.memory_space<vmem>>, vector<4x16xf32>,
    %130 = vector.extract_strided_slice %16 {offsets = [0, 5, 0], sizes = [4, 1, 16], strides = [1, 1, 1]} : vector<4x8x16xf32> to vector<4x1x16xf32>
    %131 = vector.shape_cast %130 : vector<4x1x16xf32> to vector<4x16xf32>
    %cst_54 = arith.constant 0.399999976 : f32
    %132 = vector.broadcast %cst_54 : f32 to vector<4x16xf32>
    %133 = arith.mulf %132, %131 : vector<4x16xf32>
    %134 = vector.extract_strided_slice %16 {offsets = [0, 6, 0], sizes = [4, 1, 16], strides = [1, 1, 1]} : vector<4x8x16xf32> to vector<4x1x16xf32>
    %135 = vector.shape_cast %134 : vector<4x1x16xf32> to vector<4x16xf32>
    %cst_55 = arith.constant 6.000000e-01 : f32
    %136 = vector.broadcast %cst_55 : f32 to vector<4x16xf32>
    %137 = arith.mulf %136, %135 : vector<4x16xf32>
    %138 = arith.addf %133, %137 : vector<4x16xf32>
    %c4_56 = arith.constant 4 : index
    %c209 = arith.constant 209 : index
    %139 = vector.load %arg9[%c4_56, %c209] : memref<8x290xf32, #tpu.memory_space<vmem>>, vector<4x16xf32>
    tpu.vector_store %arg9[%c4_56, %c209], %138 {strides = array<i32>} : memref<8x290xf32, #tpu.memory_space<vmem>>, vector<4x16xf32>,
    %140 = vector.extract_strided_slice %16 {offsets = [0, 6, 0], sizes = [4, 1, 16], strides = [1, 1, 1]} : vector<4x8x16xf32> to vector<4x1x16xf32>
    %141 = vector.shape_cast %140 : vector<4x1x16xf32> to vector<4x16xf32>
    %cst_57 = arith.constant 0.933333337 : f32
    %142 = vector.broadcast %cst_57 : f32 to vector<4x16xf32>
    %143 = arith.mulf %142, %141 : vector<4x16xf32>
    %144 = vector.extract_strided_slice %16 {offsets = [0, 7, 0], sizes = [4, 1, 16], strides = [1, 1, 1]} : vector<4x8x16xf32> to vector<4x1x16xf32>
    %145 = vector.shape_cast %144 : vector<4x1x16xf32> to vector<4x16xf32>
    %cst_58 = arith.constant 0.0666666701 : f32
    %146 = vector.broadcast %cst_58 : f32 to vector<4x16xf32>
    %147 = arith.mulf %146, %145 : vector<4x16xf32>
    %148 = arith.addf %143, %147 : vector<4x16xf32>
    %c4_59 = arith.constant 4 : index
    %c225 = arith.constant 225 : index
    %149 = vector.load %arg9[%c4_59, %c225] : memref<8x290xf32, #tpu.memory_space<vmem>>, vector<4x16xf32>
    tpu.vector_store %arg9[%c4_59, %c225], %148 {strides = array<i32>} : memref<8x290xf32, #tpu.memory_space<vmem>>, vector<4x16xf32>,
    %150 = vector.extract_strided_slice %16 {offsets = [0, 6, 0], sizes = [4, 1, 16], strides = [1, 1, 1]} : vector<4x8x16xf32> to vector<4x1x16xf32>
    %151 = vector.shape_cast %150 : vector<4x1x16xf32> to vector<4x16xf32>
    %cst_60 = arith.constant 0.466666639 : f32
    %152 = vector.broadcast %cst_60 : f32 to vector<4x16xf32>
    %153 = arith.mulf %152, %151 : vector<4x16xf32>
    %154 = vector.extract_strided_slice %16 {offsets = [0, 7, 0], sizes = [4, 1, 16], strides = [1, 1, 1]} : vector<4x8x16xf32> to vector<4x1x16xf32>
    %155 = vector.shape_cast %154 : vector<4x1x16xf32> to vector<4x16xf32>
    %cst_61 = arith.constant 0.533333361 : f32
    %156 = vector.broadcast %cst_61 : f32 to vector<4x16xf32>
    %157 = arith.mulf %156, %155 : vector<4x16xf32>
    %158 = arith.addf %153, %157 : vector<4x16xf32>
    %c4_62 = arith.constant 4 : index
    %c241 = arith.constant 241 : index
    %159 = vector.load %arg9[%c4_62, %c241] : memref<8x290xf32, #tpu.memory_space<vmem>>, vector<4x16xf32>
    tpu.vector_store %arg9[%c4_62, %c241], %158 {strides = array<i32>} : memref<8x290xf32, #tpu.memory_space<vmem>>, vector<4x16xf32>,
    %160 = vector.extract_strided_slice %16 {offsets = [0, 7, 0], sizes = [4, 1, 16], strides = [1, 1, 1]} : vector<4x8x16xf32> to vector<4x1x16xf32>
    %161 = vector.shape_cast %160 : vector<4x1x16xf32> to vector<4x16xf32>
    %c4_63 = arith.constant 4 : index
    %c257 = arith.constant 257 : index
    %162 = vector.load %arg9[%c4_63, %c257] : memref<8x290xf32, #tpu.memory_space<vmem>>, vector<4x16xf32>
    tpu.vector_store %arg9[%c4_63, %c257], %161 {strides = array<i32>} : memref<8x290xf32, #tpu.memory_space<vmem>>, vector<4x16xf32>,
    %163 = tpu.iota {dimensions = array<i32: 1>} : vector<1x256xi32>
    %c16_i32 = arith.constant 16 : i32
    %c0_i32 = arith.constant 0 : i32
    %164 = arith.cmpi eq, %c16_i32, %c0_i32 : i32
    %c1_i32 = arith.constant 1 : i32
    %165 = arith.select %164, %c1_i32, %c16_i32 : i32
    %166 = vector.broadcast %165 : i32 to vector<1x256xi32>
    %167 = arith.remsi %163, %166 : vector<1x256xi32>
    %c0_i32_64 = arith.constant 0 : i32
    %168 = vector.broadcast %c0_i32_64 : i32 to vector<1x256xi32>
    %169 = arith.cmpi ne, %167, %168 : vector<1x256xi32>
    %c0_i32_65 = arith.constant 0 : i32
    %170 = vector.broadcast %c0_i32_65 : i32 to vector<1x256xi32>
    %171 = arith.cmpi slt, %167, %170 : vector<1x256xi32>
    %c0_i32_66 = arith.constant 0 : i32
    %172 = arith.cmpi slt, %165, %c0_i32_66 : i32
    %173 = vector.broadcast %172 : i1 to vector<1x256xi1>
    %174 = vector.broadcast %173 : vector<1x256xi1> to vector<1x256xi1>
    %175 = arith.xori %171, %174 : vector<1x256xi1>
    %176 = arith.andi %175, %169 : vector<1x256xi1>
    %177 = vector.broadcast %165 : i32 to vector<1x256xi32>
    %178 = arith.addi %167, %177 : vector<1x256xi32>
    %179 = arith.select %176, %178, %167 : vector<1x256xi1>, vector<1x256xi32>
    %c1_i32_67 = arith.constant 1 : i32
    %180 = vector.broadcast %c1_i32_67 : i32 to vector<1x256xi32>
    %181 = arith.cmpi sge, %179, %180 : vector<1x256xi32>
    %c15_i32 = arith.constant 15 : i32
    %182 = vector.broadcast %c15_i32 : i32 to vector<1x256xi32>
    %183 = arith.cmpi slt, %179, %182 : vector<1x256xi32>
    %c0_68 = arith.constant 0 : index
    %c0_69 = arith.constant 0 : index
    %184 = vector.load %arg4[%c0_68, %c0_69] : memref<4x72xf32, #tpu.memory_space<vmem>>, vector<4x72xf32>
    %c0_70 = arith.constant 0 : index
    %c0_71 = arith.constant 0 : index
    %185 = vector.load %arg9[%c0_70, %c0_71] : memref<8x290xf32, #tpu.memory_space<vmem>>, vector<8x256xf32>
    %cst_72 = arith.constant 0.000000e+00 : f32
    %186 = vector.shape_cast %181 : vector<1x256xi1> to vector<1x256xi1>
    %187 = vector.broadcast %186 : vector<1x256xi1> to vector<8x256xi1>
    %188 = vector.broadcast %cst_72 : f32 to vector<8x256xf32>
    %189 = arith.select %187, %185, %188 : vector<8x256xi1>, vector<8x256xf32>
    %c0_73 = arith.constant 0 : index
    %c1 = arith.constant 1 : index
    %190 = vector.load %arg9[%c0_73, %c1] : memref<8x290xf32, #tpu.memory_space<vmem>>, vector<8x256xf32>
    %c0_74 = arith.constant 0 : index
    %c2 = arith.constant 2 : index
    %191 = vector.load %arg9[%c0_74, %c2] : memref<8x290xf32, #tpu.memory_space<vmem>>, vector<8x256xf32>
    %cst_75 = arith.constant 0.000000e+00 : f32
    %192 = vector.shape_cast %183 : vector<1x256xi1> to vector<1x256xi1>
    %193 = vector.broadcast %192 : vector<1x256xi1> to vector<8x256xi1>
    %194 = vector.broadcast %cst_75 : f32 to vector<8x256xf32>
    %195 = arith.select %193, %191, %194 : vector<8x256xi1>, vector<8x256xf32>
    %c0_76 = arith.constant 0 : index
    %c16 = arith.constant 16 : index
    %196 = vector.load %arg9[%c0_76, %c16] : memref<8x290xf32, #tpu.memory_space<vmem>>, vector<8x256xf32>
    %cst_77 = arith.constant 0.000000e+00 : f32
    %197 = vector.shape_cast %181 : vector<1x256xi1> to vector<1x256xi1>
    %198 = vector.broadcast %197 : vector<1x256xi1> to vector<8x256xi1>
    %199 = vector.broadcast %cst_77 : f32 to vector<8x256xf32>
    %200 = arith.select %198, %196, %199 : vector<8x256xi1>, vector<8x256xf32>
    %c0_78 = arith.constant 0 : index
    %c17_79 = arith.constant 17 : index
    %201 = vector.load %arg9[%c0_78, %c17_79] : memref<8x290xf32, #tpu.memory_space<vmem>>, vector<8x256xf32>
    %c0_80 = arith.constant 0 : index
    %c18 = arith.constant 18 : index
    %202 = vector.load %arg9[%c0_80, %c18] : memref<8x290xf32, #tpu.memory_space<vmem>>, vector<8x256xf32>
    %cst_81 = arith.constant 0.000000e+00 : f32
    %203 = vector.shape_cast %183 : vector<1x256xi1> to vector<1x256xi1>
    %204 = vector.broadcast %203 : vector<1x256xi1> to vector<8x256xi1>
    %205 = vector.broadcast %cst_81 : f32 to vector<8x256xf32>
    %206 = arith.select %204, %202, %205 : vector<8x256xi1>, vector<8x256xf32>
    %c0_82 = arith.constant 0 : index
    %c32 = arith.constant 32 : index
    %207 = vector.load %arg9[%c0_82, %c32] : memref<8x290xf32, #tpu.memory_space<vmem>>, vector<8x256xf32>
    %cst_83 = arith.constant 0.000000e+00 : f32
    %208 = vector.shape_cast %181 : vector<1x256xi1> to vector<1x256xi1>
    %209 = vector.broadcast %208 : vector<1x256xi1> to vector<8x256xi1>
    %210 = vector.broadcast %cst_83 : f32 to vector<8x256xf32>
    %211 = arith.select %209, %207, %210 : vector<8x256xi1>, vector<8x256xf32>
    %c0_84 = arith.constant 0 : index
    %c33_85 = arith.constant 33 : index
    %212 = vector.load %arg9[%c0_84, %c33_85] : memref<8x290xf32, #tpu.memory_space<vmem>>, vector<8x256xf32>
    %c0_86 = arith.constant 0 : index
    %c34 = arith.constant 34 : index
    %213 = vector.load %arg9[%c0_86, %c34] : memref<8x290xf32, #tpu.memory_space<vmem>>, vector<8x256xf32>
    %cst_87 = arith.constant 0.000000e+00 : f32
    %214 = vector.shape_cast %183 : vector<1x256xi1> to vector<1x256xi1>
    %215 = vector.broadcast %214 : vector<1x256xi1> to vector<8x256xi1>
    %216 = vector.broadcast %cst_87 : f32 to vector<8x256xf32>
    %217 = arith.select %215, %213, %216 : vector<8x256xi1>, vector<8x256xf32>
    %218 = tpu.concatenate %189, %190, %195, %200, %201, %206, %211, %212, %217 in 0 : vector<8x256xf32>, vector<8x256xf32>, vector<8x256xf32>, vector<8x256xf32>, vector<8x256xf32>, vector<8x256xf32>, vector<8x256xf32>, vector<8x256xf32>, vector<8x256xf32> -> vector<72x256xf32>
    %cst_88 = arith.constant dense<0.000000e+00> : vector<4x256xf32>
    %219 = tpu.matmul %184, %218, %cst_88 {dimension_numbers = #tpu.dot_dimension_numbers<[1], [0], [0], [1], [0, 0, 1, 1], [], []>} : vector<4x72xf32>, vector<72x256xf32>, vector<4x256xf32> -> vector<4x256xf32>
    %c0_89 = arith.constant 0 : index
    %c0_90 = arith.constant 0 : index
    %220 = vector.load %arg5[%c0_89, %c0_90] : memref<4x1xf32, #tpu.memory_space<vmem>>, vector<4x1xf32>
    %221 = vector.broadcast %220 : vector<4x1xf32> to vector<4x256xf32>
    %222 = arith.addf %219, %221 : vector<4x256xf32>
    %cst_91 = arith.constant 0.000000e+00 : f32
    %223 = vector.broadcast %cst_91 : f32 to vector<4x256xf32>
    %224 = arith.maximumf %222, %223 : vector<4x256xf32>
    %c0_92 = arith.constant 0 : index
    %c17_93 = arith.constant 17 : index
    %225 = vector.load %arg10[%c0_92, %c17_93] : memref<4x290xf32, #tpu.memory_space<vmem>>, vector<4x256xf32>
    tpu.vector_store %arg10[%c0_92, %c17_93], %224 {strides = array<i32>} : memref<4x290xf32, #tpu.memory_space<vmem>>, vector<4x256xf32>,
    %c0_94 = arith.constant 0 : index
    %c0_95 = arith.constant 0 : index
    %226 = vector.load %arg6[%c0_94, %c0_95] : memref<4x36xf32, #tpu.memory_space<vmem>>, vector<4x36xf32>
    %c0_96 = arith.constant 0 : index
    %c0_97 = arith.constant 0 : index
    %227 = vector.load %arg10[%c0_96, %c0_97] : memref<4x290xf32, #tpu.memory_space<vmem>>, vector<4x256xf32>
    %cst_98 = arith.constant 0.000000e+00 : f32
    %228 = vector.shape_cast %181 : vector<1x256xi1> to vector<1x256xi1>
    %229 = vector.broadcast %228 : vector<1x256xi1> to vector<4x256xi1>
    %230 = vector.broadcast %cst_98 : f32 to vector<4x256xf32>
    %231 = arith.select %229, %227, %230 : vector<4x256xi1>, vector<4x256xf32>
    %c0_99 = arith.constant 0 : index
    %c1_100 = arith.constant 1 : index
    %232 = vector.load %arg10[%c0_99, %c1_100] : memref<4x290xf32, #tpu.memory_space<vmem>>, vector<4x256xf32>
    %c0_101 = arith.constant 0 : index
    %c2_102 = arith.constant 2 : index
    %233 = vector.load %arg10[%c0_101, %c2_102] : memref<4x290xf32, #tpu.memory_space<vmem>>, vector<4x256xf32>
    %cst_103 = arith.constant 0.000000e+00 : f32
    %234 = vector.shape_cast %183 : vector<1x256xi1> to vector<1x256xi1>
    %235 = vector.broadcast %234 : vector<1x256xi1> to vector<4x256xi1>
    %236 = vector.broadcast %cst_103 : f32 to vector<4x256xf32>
    %237 = arith.select %235, %233, %236 : vector<4x256xi1>, vector<4x256xf32>
    %c0_104 = arith.constant 0 : index
    %c16_105 = arith.constant 16 : index
    %238 = vector.load %arg10[%c0_104, %c16_105] : memref<4x290xf32, #tpu.memory_space<vmem>>, vector<4x256xf32>
    %cst_106 = arith.constant 0.000000e+00 : f32
    %239 = vector.shape_cast %181 : vector<1x256xi1> to vector<1x256xi1>
    %240 = vector.broadcast %239 : vector<1x256xi1> to vector<4x256xi1>
    %241 = vector.broadcast %cst_106 : f32 to vector<4x256xf32>
    %242 = arith.select %240, %238, %241 : vector<4x256xi1>, vector<4x256xf32>
    %c0_107 = arith.constant 0 : index
    %c17_108 = arith.constant 17 : index
    %243 = vector.load %arg10[%c0_107, %c17_108] : memref<4x290xf32, #tpu.memory_space<vmem>>, vector<4x256xf32>
    %c0_109 = arith.constant 0 : index
    %c18_110 = arith.constant 18 : index
    %244 = vector.load %arg10[%c0_109, %c18_110] : memref<4x290xf32, #tpu.memory_space<vmem>>, vector<4x256xf32>
    %cst_111 = arith.constant 0.000000e+00 : f32
    %245 = vector.shape_cast %183 : vector<1x256xi1> to vector<1x256xi1>
    %246 = vector.broadcast %245 : vector<1x256xi1> to vector<4x256xi1>
    %247 = vector.broadcast %cst_111 : f32 to vector<4x256xf32>
    %248 = arith.select %246, %244, %247 : vector<4x256xi1>, vector<4x256xf32>
    %c0_112 = arith.constant 0 : index
    %c32_113 = arith.constant 32 : index
    %249 = vector.load %arg10[%c0_112, %c32_113] : memref<4x290xf32, #tpu.memory_space<vmem>>, vector<4x256xf32>
    %cst_114 = arith.constant 0.000000e+00 : f32
    %250 = vector.shape_cast %181 : vector<1x256xi1> to vector<1x256xi1>
    %251 = vector.broadcast %250 : vector<1x256xi1> to vector<4x256xi1>
    %252 = vector.broadcast %cst_114 : f32 to vector<4x256xf32>
    %253 = arith.select %251, %249, %252 : vector<4x256xi1>, vector<4x256xf32>
    %c0_115 = arith.constant 0 : index
    %c33_116 = arith.constant 33 : index
    %254 = vector.load %arg10[%c0_115, %c33_116] : memref<4x290xf32, #tpu.memory_space<vmem>>, vector<4x256xf32>
    %c0_117 = arith.constant 0 : index
    %c34_118 = arith.constant 34 : index
    %255 = vector.load %arg10[%c0_117, %c34_118] : memref<4x290xf32, #tpu.memory_space<vmem>>, vector<4x256xf32>
    %cst_119 = arith.constant 0.000000e+00 : f32
    %256 = vector.shape_cast %183 : vector<1x256xi1> to vector<1x256xi1>
    %257 = vector.broadcast %256 : vector<1x256xi1> to vector<4x256xi1>
    %258 = vector.broadcast %cst_119 : f32 to vector<4x256xf32>
    %259 = arith.select %257, %255, %258 : vector<4x256xi1>, vector<4x256xf32>
    %260 = tpu.concatenate %231, %232, %237, %242, %243, %248, %253, %254, %259 in 0 : vector<4x256xf32>, vector<4x256xf32>, vector<4x256xf32>, vector<4x256xf32>, vector<4x256xf32>, vector<4x256xf32>, vector<4x256xf32>, vector<4x256xf32>, vector<4x256xf32> -> vector<36x256xf32>
    %cst_120 = arith.constant dense<0.000000e+00> : vector<4x256xf32>
    %261 = tpu.matmul %226, %260, %cst_120 {dimension_numbers = #tpu.dot_dimension_numbers<[1], [0], [0], [1], [0, 0, 1, 1], [], []>} : vector<4x36xf32>, vector<36x256xf32>, vector<4x256xf32> -> vector<4x256xf32>
    %c0_121 = arith.constant 0 : index
    %c0_122 = arith.constant 0 : index
    %262 = vector.load %arg7[%c0_121, %c0_122] : memref<4x1xf32, #tpu.memory_space<vmem>>, vector<4x1xf32>
    %263 = vector.broadcast %262 : vector<4x1xf32> to vector<4x256xf32>
    %264 = arith.addf %261, %263 : vector<4x256xf32>
    %cst_123 = arith.constant 0.000000e+00 : f32
    %265 = vector.broadcast %cst_123 : f32 to vector<4x256xf32>
    %266 = arith.maximumf %264, %265 : vector<4x256xf32>
    %c0_124 = arith.constant 0 : index
    %c0_125 = arith.constant 0 : index
    %c0_126 = arith.constant 0 : index
    %267 = vector.load %arg8[%c0_124, %c0_125, %c0_126] : memref<1x4x256xf32, #tpu.memory_space<vmem>>, vector<1x4x256xf32>
    %268 = vector.shape_cast %267 : vector<1x4x256xf32> to vector<4x256xf32>
    %269 = vector.shape_cast %266 : vector<4x256xf32> to vector<1x4x256xf32>
    tpu.vector_store %arg8[%c0_124, %c0_125, %c0_126], %269 {strides = array<i32>} : memref<1x4x256xf32, #tpu.memory_space<vmem>>, vector<1x4x256xf32>,
    return
  }
  func.func @transform_0(%arg0: i32) -> (i32, i32, i32, i32) {
    %c0_i32 = arith.constant 0 : i32
    %c0_i32_0 = arith.constant 0 : i32
    %c0_i32_1 = arith.constant 0 : i32
    %c0_i32_2 = arith.constant 0 : i32
    return %arg0, %c0_i32, %c0_i32_0, %c0_i32_1 : i32, i32, i32, i32
  }
  func.func @transform_1(%arg0: i32) -> (i32, i32, i32) {
    %c0_i32 = arith.constant 0 : i32
    %c0_i32_0 = arith.constant 0 : i32
    %c0_i32_1 = arith.constant 0 : i32
    return %arg0, %c0_i32, %c0_i32_0 : i32, i32, i32
  }
  func.func @transform_2(%arg0: i32) -> (i32, i32) {
    %c0_i32 = arith.constant 0 : i32
    %c0_i32_0 = arith.constant 0 : i32
    %c0_i32_1 = arith.constant 0 : i32
    return %c0_i32, %c0_i32_0 : i32, i32
  }
  func.func @transform_3(%arg0: i32) -> (i32, i32) {
    %c0_i32 = arith.constant 0 : i32
    %c0_i32_0 = arith.constant 0 : i32
    %c0_i32_1 = arith.constant 0 : i32
    return %c0_i32, %c0_i32_0 : i32, i32
  }
  func.func @transform_4(%arg0: i32) -> (i32, i32) {
    %c0_i32 = arith.constant 0 : i32
    %c0_i32_0 = arith.constant 0 : i32
    %c0_i32_1 = arith.constant 0 : i32
    return %c0_i32, %c0_i32_0 : i32, i32
  }
  func.func @transform_5(%arg0: i32) -> (i32, i32) {
    %c0_i32 = arith.constant 0 : i32
    %c0_i32_0 = arith.constant 0 : i32
    %c0_i32_1 = arith.constant 0 : i32
    return %c0_i32, %c0_i32_0 : i32, i32
  }
  func.func @transform_6(%arg0: i32) -> (i32, i32) {
    %c0_i32 = arith.constant 0 : i32
    %c0_i32_0 = arith.constant 0 : i32
    %c0_i32_1 = arith.constant 0 : i32
    return %c0_i32, %c0_i32_0 : i32, i32
  }
  func.func @transform_7(%arg0: i32) -> (i32, i32, i32) {
    %c0_i32 = arith.constant 0 : i32
    %c0_i32_0 = arith.constant 0 : i32
    %c0_i32_1 = arith.constant 0 : i32
    return %arg0, %c0_i32, %c0_i32_0 : i32, i32, i32
  }
}

</mosaic_0001>

<bundles_post_ra>
// kernel: tpu_custom_call.1
= control target key start
LH: loop header
LB: loop body
LE: loop exit
PB: predicated region body
PF: predicated region fallthrough
CT: control target
= control target key end

     0   :  { %s2573_s0 = inlined_call_operand.hbm [shape: f32[2,4,8,8], index: 0, kind: input, shape index: {}]   ;;  %s2574_s1 = inlined_call_operand.hbm [shape: f32[2,4,256], index: 1, kind: input, shape index: {}]   ;;  %s2575_s2 = inlined_call_operand.vmem [shape: f32[8,16], index: 2, kind: input, shape index: {}]   ;;  %s2576_s3 = inlined_call_operand.vmem [shape: f32[4,72], index: 3, kind: input, shape index: {}]   ;;  %s2577_s4 = inlined_call_operand.vmem [shape: f32[4,1], index: 4, kind: input, shape index: {}]   ;;  %s2578_s5 = inlined_call_operand.vmem [shape: f32[4,36], index: 5, kind: input, shape index: {}]   ;;  %s2579_s6 = inlined_call_operand.vmem [shape: f32[4,1], index: 6, kind: input, shape index: {}]   ;;  %s2580_s7 = inlined_call_operand.hbm [shape: f32[2,4,256], index: 7, kind: output, shape index: {}]  }
   0x1   :  { %2589 = sst [smem:[#allocation16_spill]] %s2573_s0 }
   0x2   :  { %12 = vsyncpa [#allocation5], 0 }
   0x3   :  { %14 = vsyncpa [#allocation5 + $0x1], 0 }
   0x4   :  { %15 = vsyncpa [#allocation8], 0 }
   0x5   :  { %17 = vsyncpa [#allocation8 + $0x1], 0 }
   0x6   :  { %18 = vsyncpa [#allocation6], 0 }
   0x7   :  { %20 = vsyncpa [#allocation6 + $0x1], 0  ;;  %s1906_s24 = smov 0   ;;  %s1908_s25 = smov 0  }
   0x8   :  { %s1910_s26 = smov 0   ;;  %s1912_s27 = smov 0  }
   0x9 LB: > { %2590 = sst [smem:[#allocation13_spill]] %s1837_s26  ;;  %s1927_s28 = sadd.s32 4294967295, %s1841_s27   ;;  %s1841_s27 = sphi %s1912_s27, %s2619_s27   ;;  %s1837_s26 = sphi %s1910_s26, %s2621_s26   ;;  %s1833_s25 = sphi %s1908_s25, %s2623_s25   ;;  %s1829_s24 = sphi %s1906_s24, %s2622_s24  }
   0xa   : > { %s1586_s29 = sadd.s32 4294967294, %s1841_s27   ;;  %s1931_s30 = sadd.s32 1, %s1841_s27  }
   0xb   : > { %2591 = sst [smem:[#allocation14_spill]] %s1931_s30  ;;  %s33_s8 = sadd.s32 1, %s1837_s26 }
   0xc   : > { %s30_s9 = ssub.s32 %s1841_s27, %s1931_s30  ;;  %p40_p0 = scmp.ne.s32.totalorder %s1837_s26, %s1833_s25 }
   0xd   : > { %p31_p1 = scmp.eq.s32.totalorder %s30_s9, 0  ;;  %p41_p2 = scmp.eq.s32.totalorder %s1841_s27, 0 }
   0xe   : > { %p46_p3 = scmp.ne.s32.totalorder %s1833_s25, %s1829_s24  ;;  %p47_p4 = scmp.eq.s32.totalorder %s1927_s28, 0 }
   0xf   : > { %s1943_s10 = scalar_select %p31_p1, %s1837_s26, %s33_s8  }
  0x10   : > { %p1945_p5 = por %p41_p2, %p40_p0  ;;  %p1949_p6 = por %p47_p4, %p46_p3 }
  0x11   : > { %2592 = sst [smem:[#allocation15_spill]] %s1943_s10  ;;  %p201_p7 = scmp.eq.s32.totalorder %s1927_s28, 1 }
  0x12   : > { %s2594_s12 = scalar_select %p1949_p6, 1, 0 }
  0x13   : > { %p207_p8 = scmp.eq.s32.totalorder %s1586_s29, 1  ;;  %p1657_p10 = scmp.lt.s32.totalorder %s1841_s27, 2 }
  0x14   : > { %p1956_p11 = por %p201_p7, %p40_p0  ;;  %s1965_s15 = sand.u32 1, %s1837_s26  }
  0x15   : > { %p1960_p12 = por %p207_p8, %p46_p3  ;;  %s1624_s16 = sshll.u32 %s1841_s27, 9 }
  0x16   : > { %s2595_s13 = scalar_select %p1956_p11, 1, 0 }
  0x17   : > { %s2596_s14 = scalar_select %p1960_p12, 1, 0 }
  0x18   : > { %s1589_s17 = sshll.u32 %s1965_s15, 5  ;;  %s2597_s0 = sld [smem:[#allocation16_spill]] }
  0x19   : > { %s246_s21 = scalar_lea.vmem [#allocation4], %s1589_s17  ;;  %p1976_p13 = pnand %p1657_p10, %p1945_p5 }
  0x1a   : > { %s253_s22 = sshll.u32 %s246_s21, 4  ;;  %s243_s29 = scalar_lea.sflag [#allocation5], %s1965_s15  ;;  %s1980_s22 = int_to_ptr.vmem [resolvable:$true] %s253_s22 }
  0x1b   : > { %p1719_p1 = pneg %p1976_p13 }
  0x1e   : > { %s1972_s20 = scalar_lea.hbm %s2597_s0, %s1624_s16  ;;  %s1722_s11 = scalar_lea.hbm %s2597_s0, 1024 }
  0x1f   : > { %s1717_s8 = scalar_lea.hbm %s1972_s20, 512  ;;  %p1723_p4 = scmp.lt.s32.totalorder %s1972_s20, %s2597_s0 }
  0x20   : > { %p1718_p0 = scmp.ne.s32.totalorder %s1972_s20, %s1717_s8  ;;  %p1724_p5 = scmp.lt.s32.totalorder %s1722_s11, %s1717_s8 }
  0x22   : > { %p1720_p2 = pnand %p1719_p1, %p1718_p0  ;;  %p1725_p7 = por %p1724_p5, %p1723_p4 }
  0x24   : > { %p1721_p3 = pneg %p1720_p2 }
  0x26   : > { %p1726_p8 = pnand %p1725_p7, %p1721_p3 }
  0x28   : > { %1729 = shalt.err (!%p1726_p8)
}
  0x29   : > { %s1730_s19 = scalar_lea.vmem %s1980_s22, 512  ;;  %s1843_s21 = smov [#allocation4]  }
  0x2a   : > { %p1731_p10 = scmp.ne.s32.totalorder %s1980_s22, %s1730_s19  ;;  %s1735_s9 = sshll.u32 %s1843_s21, 4  ;;  %s1736_s9 = int_to_ptr.vmem [resolvable:$false] %s1735_s9 }
  0x2b   : > { %s1737_s16 = scalar_lea.vmem %s1736_s9, 1024  ;;  %p1738_p9 = scmp.lt.s32.totalorder %s1980_s22, %s1736_s9 }
  0x2c   : > { %p1733_p0 = pnand %p1731_p10, %p1719_p1  ;;  %p1739_p12 = scmp.lt.s32.totalorder %s1737_s16, %s1730_s19 }
  0x2e   : > { %p1734_p2 = pneg %p1733_p0  ;;  %p1740_p11 = por %p1739_p12, %p1738_p9 }
  0x30   : > { %p1741_p4 = pnand %p1740_p11, %p1734_p2 }
  0x32   : > { %1744 = shalt.err (!%p1741_p4)
}
  0x33   : > { %s1844_s8 = smov 128   ;;  %s1845_s11 = smov 8  }
  0x34   : > { %1649 = dma.hbm_to_vmem [thread:$0]  (!%p1976_p13), %s1972_s20, 512, %s1980_s22, %s243_s29, %s1844_s8, %s1844_s8, %s1845_s11  }
  0x35   : > { %p1595_p3 = scmp.ge.s32.totalorder %s1841_s27, 1  ;;  %p280_p5 = scmp.lt.s32.totalorder %s1841_s27, 3 }
  0x36   : > { %s1592_s17 = sshll.u32 %s1965_s15, 3  ;;  %s1625_s19 = sshll.u32 %s1841_s27, 7 }
  0x37   : > { %p2012_p9 = pnand %p1595_p3, %p280_p5  ;;  %s267_s21 = scalar_lea.vmem [#allocation7], %s1592_s17 }
  0x38   : > { %s275_s9 = sshll.u32 %s267_s21, 4  ;;  %s273_s10 = scalar_lea.hbm %s2574_s1, %s1625_s19  ;;  %s276_s9 = int_to_ptr.vmem [resolvable:$true] %s275_s9 }
  0x39   : > { %s2599_s18 = scalar_select %p2012_p9, 1, 0 }
  0x3a   : > { %s264_s26 = scalar_lea.sflag [#allocation8], %s1965_s15  ;;  %s1745_s30 = scalar_lea.hbm %s273_s10, 128 }
  0x3b   : > { %p1746_p11 = scmp.ne.s32.totalorder %s273_s10, %s1745_s30  ;;  %s1750_s29 = scalar_lea.hbm %s2574_s1, 256 }
  0x3c   : > { %p1751_p8 = scmp.lt.s32.totalorder %s273_s10, %s2574_s1  ;;  %p1752_p10 = scmp.lt.s32.totalorder %s1750_s29, %s1745_s30 }
  0x3d   : > { %p1748_p12 = pnand %p1746_p11, %p1719_p1 }
  0x3e   : > { %p1753_p0 = por %p1752_p10, %p1751_p8 }
  0x3f   : > { %p1749_p7 = pneg %p1748_p12 }
  0x41   : > { %p1754_p2 = pnand %p1753_p0, %p1749_p7 }
  0x43   : > { %1757 = shalt.err (!%p1754_p2)
}
  0x44   : > { %s1758_s0 = scalar_lea.vmem %s276_s9, 128  ;;  %s1846_s15 = smov [#allocation7]  }
  0x45   : > { %p1759_p4 = scmp.ne.s32.totalorder %s276_s9, %s1758_s0  ;;  %s1763_s17 = sshll.u32 %s1846_s15, 4  ;;  %s1764_s17 = int_to_ptr.vmem [resolvable:$false] %s1763_s17 }
  0x46   : > { %s1765_s19 = scalar_lea.vmem %s1764_s17, 256  ;;  %p1766_p11 = scmp.lt.s32.totalorder %s276_s9, %s1764_s17 }
  0x47   : > { %p1761_p3 = pnand %p1759_p4, %p1719_p1  ;;  %p1767_p12 = scmp.lt.s32.totalorder %s1765_s19, %s1758_s0 }
  0x49   : > { %p1762_p5 = pneg %p1761_p3  ;;  %p1768_p6 = por %p1767_p12, %p1766_p11 }
  0x4b   : > { %p1769_p9 = pnand %p1768_p6, %p1762_p5 }
  0x4d   : > { %1772 = shalt.err (!%p1769_p9)
}
  0x4e   : > { %1652 = dma.hbm_to_vmem [thread:$0]  (!%p1976_p13), %s273_s10, 128, %s276_s9, %s264_s26  }
  0x4f   : > { %p2600_p7 = scmp.ne.s32.totalorder %s2599_s18, 0 }
  0x50   : > { %s2038_s30 = sand.u32 (!%p2600_p7), 1, %s1833_s25   ;;  %p2601_p1 = scmp.ne.s32.totalorder (!%p2600_p7), %s2594_s12, 0 }
  0x51   : > { %284 = sbr.rel (%p2600_p7) target bundleno = 1347 (0x543), region = 48  ;;  %s1596_s21 = sshll.u32 (!%p2600_p7), %s2038_s30, 5 }
  0x52   : > { %s287_s16 = scalar_lea.sflag (!%p2600_p7), [#allocation5], %s2038_s30  ;;  %s290_s20 = scalar_lea.vmem (!%p2600_p7), [#allocation4], %s1596_s21 }
  0x56   : > { %1816 = dma.done.wait (%p2601_p1), %s287_s16, 512  }
  0x57   : > { %1818 = vsyncadd (%p2601_p1), %s287_s16, 4294966784  ;;  %s1597_s26 = sshll.u32 %s2038_s30, 3  ;;  %s296_s10 = scalar_lea.sflag [#allocation8], %s2038_s30 }
  0x58   : > { %s299_s23 = scalar_lea.vmem [#allocation7], %s1597_s26 }
  0x59   : > { %1820 = dma.done.wait (%p2601_p1), %s296_s10, 128  }
  0x5a   : > { %1822 = vsyncadd (%p2601_p1), %s296_s10, 4294967168  ;;  %vm363_vm0 = vcmask 64512   ;;  %v362_v0 = vld [vmem:[%s2575_s2] sm:$0xff]  ;;  %v359_v2 = vld [vmem:[%s290_s20 + $0x8] sm:$0xff]  ;;  %s1847_s22 = smov 17   ;;  %vm335_vm1 = vcmask 138240  }
  0x5b   : > { %v358_v1 = vld [vmem:[%s290_s20] sm:$0xff]  ;;  %1632 = vmatprep.subr.mxu0 %v362_v0  ;;  %v360_v3 = vld [vmem:[%s290_s20 + $0x10] sm:$0xff]  ;;  %v361_v4 = vld [vmem:[%s290_s20 + $0x18] sm:$0xff]  ;;  %v1848_v7 = vmov 0.0   ;;  %vm337_vm2 = vcmask 277640   ;;  %vm339_vm3 = vcmask 134144  }
  0x5c   : > { %1634 = vmatprep.mubr.msk.f32.mxu0 %vm363_vm0, %v358_v1  ;;  %1633 = vmatpush3.msra.mxu0 %v362_v0  ;;  %v343_v5 = vld [vmem:[%s299_s23] sm:$0xff]  ;;  %336 = vst.msk [vmem:[#allocation2] sm:$0xff] %vm335_vm1, %v1848_v7  ;;  %vm354_vm4 = vcmask 1043592   ;;  %vm467_vm5 = vcmask 1045509   ;;  %vm470_vm6 = vcmask 1046534   ;;  %vm473_vm7 = vcmask 1047559  }
  0x5d   : > { %1635 = vmatmul.mubr.msk.f32.vlgmr.msra.gmra.mxu0 %vm363_vm0, %v359_v2  ;;  %v345_v6 = vcombine.high %v343_v5, %v343_v5  ;;  %346 = vrot.lane.b32.xlu1 %v343_v5, %s1847_s22  ;;  %338 = vst.msk [vmem:[#allocation2 + $0x10] sm:$0xff] %vm337_vm2, %v1848_v7  ;;  %s1849_s12 = smov 113   ;;  %s1850_s29 = smov 97   ;;  %vm478_vm8 = vcmask 269452   ;;  %vm720_vm9 = vcmask 7172   ;;  %vm518_vm10 = vcmask 400652  }
  0x5e   : > { %1637 = vmatprep.mubr.msk.f32.mxu0 %vm363_vm0, %v360_v3  ;;  %1240 = vmatprep.mubr.f32.mxu1 %v1848_v7  ;;  %340 = vst.msk [vmem:[#allocation3] sm:$0xf] %vm339_vm3, %v1848_v7  ;;  %s1851_s8 = smov 33   ;;  %s1852_s11 = smov 1   ;;  %vm760_vm11 = vcmask 138252   ;;  %vm558_vm12 = vcmask 531852  }
  0x5f   : > { %348 = vrot.lane.b32.xlu0 %v345_v6, %s1847_s22  ;;  %s1853_s0 = smov 49   ;;  %s1854_s15 = smov 65   ;;  %vm598_vm13 = vcmask 663052   ;;  %vm638_vm14 = vcmask 794252   ;;  %vm678_vm15 = vcmask 925452   ;;  %vm1126_vm2 = vcmask 769024  }
  0x60   : > { %s1855_s17 = smov 81   ;;  %s1856_s19 = smov 95  }
  0x61   : > { %1638 = vmatmul.mubr.msk.f32.gmra.mxu0 %vm363_vm0, %v361_v4  ;;  %vm718_vm0 = vcmask 1048460   ;;  %s1857_s21 = smov 94   ;;  %s1858_s16 = smov 110  }
  0x62   : > { %1464 = vmatprep.mubr.f32.mxu0 %v1848_v7  ;;  %s1859_s20 = smov 96   ;;  %s1860_s10 = smov 112  }
  0x63   : > { %s1861_s23 = smov 111   ;;  %s1862_s18 = smov 126  }
  0x64   : > { %s1864_s9 = smov 127   ;;  %p2616_p13 = scmp.ne.s32.totalorder %s2595_s13, 0 }
  0xcf   : > { %v347_v8 = vpop.permute.xlu1 %346 }
  0xd0   : > { %355 = vst.msk [vmem:[#allocation2] sm:$0xf] %vm354_vm4, %v347_v8 }
  0xd1   : > { %v349_v9 = vpop.permute.xlu0 %348 }
  0xd2   : > { %v350_v10 = vsel %vm335_vm1, %v347_v8, %v349_v9  ;;  %357 = vst.msk [vmem:[#allocation2 + $0x10] sm:$0xf] %vm339_vm3, %v349_v9 }
  0xd3   : > { %356 = vst [vmem:[#allocation2 + $0x8] sm:$0xf] %v350_v10 }
 0x11d   : > { %v2069_v11 = vpop.f32.mrf.mxu0 }
 0x11e   : > { %v466_v12 = vrot.slane %v2069_v11, 3  ;;  %v972_v13 = vmul.f32 0.46666664, %v2069_v11  ;;  %v976_v14 = vmul.f32 0.53333336, %v2069_v11 }
 0x11f   : > { %v2074_v15 = vpop.f32.mrf.mxu0  ;;  %v2077_v16 = vmul.f32 0.93333334, %v2069_v11  ;;  %v938_v17 = vmul.f32 0.06666667, %v2069_v11  ;;  %v2081_v18 = vmul.f32 0.73333335, %v2069_v11 }
 0x120   : > { %v465_v19 = vrot.slane %v2074_v15, 4  ;;  %v971_v20 = vmul.f32 0.46666664, %v2074_v15  ;;  %v975_v21 = vmul.f32 0.53333336, %v2074_v15  ;;  %v984_v22 = vrot.slane %v976_v14, 1 }
 0x121   : > { %v2086_v23 = vpop.f32.mrf.mxu0  ;;  %v2089_v24 = vmul.f32 0.93333334, %v2074_v15  ;;  %v937_v25 = vmul.f32 0.06666667, %v2074_v15  ;;  %v946_v26 = vrot.slane %v938_v17, 1  ;;  %v771_v27 = vrot.slane %v2081_v18, 1 }
 0x122   : > { %v468_v28 = vsel %vm467_vm5, %v466_v12, %v465_v19  ;;  %v472_v29 = vrot.slane %v2086_v23, 1  ;;  %v974_v30 = vmul.f32 0.46666664, %v2086_v23  ;;  %v978_v31 = vmul.f32 0.53333336, %v2086_v23 }
 0x123   : > { %v2097_v32 = vpop.f32.mrf.mxu0  ;;  %v983_v33 = vrot.slane %v975_v21, 1  ;;  %v992_v34 = vadd.f32 %v984_v22, %v972_v13  ;;  %v2100_v35 = vmul.f32 0.93333334, %v2086_v23  ;;  %v940_v36 = vmul.f32 0.06666667, %v2086_v23 }
 0x124   : > { %v469_v37 = vrot.slane %v2097_v32, 2  ;;  %v973_v38 = vmul.f32 0.46666664, %v2097_v32  ;;  %v977_v39 = vmul.f32 0.53333336, %v2097_v32  ;;  %v986_v40 = vrot.slane %v978_v31, 1 }
 0x125   : > { %v991_v41 = vadd.f32 %v983_v33, %v971_v20  ;;  %v1000_v42 = vrot.slane %v992_v34, 1  ;;  %v2107_v43 = vmul.f32 0.93333334, %v2097_v32  ;;  %v939_v44 = vmul.f32 0.06666667, %v2097_v32 }
 0x126   : > { %v471_v45 = vsel %vm470_vm6, %v469_v37, %v468_v28  ;;  %v985_v46 = vrot.slane %v977_v39, 1  ;;  %v994_v47 = vadd.f32 %v986_v40, %v974_v30  ;;  %v945_v48 = vrot.slane %v937_v25, 1 }
 0x127   : > { %v474_v49 = vsel %vm473_vm7, %v472_v29, %v471_v45  ;;  %v999_v50 = vrot.slane %v991_v41, 2  ;;  %v947_v51 = vrot.slane %v939_v44, 1  ;;  %v948_v52 = vrot.slane %v940_v36, 1 }
 0x128   : > { %475 = vrot.lane.b32.xlu1 %v474_v49, %s1847_s22  ;;  %v993_v53 = vadd.f32 %v985_v46, %v973_v38  ;;  %v1003_v54 = vrot.slane %v994_v47, 7  ;;  %v953_v55 = vadd.f32 %v945_v48, %v2089_v24  ;;  %v954_v56 = vadd.f32 %v946_v26, %v2077_v16 }
 0x129   : > { %v1001_v57 = vsel %vm467_vm5, %v1000_v42, %v999_v50  ;;  %v955_v58 = vadd.f32 %v947_v51, %v2107_v43  ;;  %v956_v59 = vadd.f32 %v948_v52, %v2100_v35  ;;  %v2119_v60 = vmul.f32 0.73333335, %v2074_v15 }
 0x12a   : > { %v1002_v61 = vsel %vm470_vm6, %v993_v53, %v1001_v57  ;;  %v961_v62 = vrot.slane %v953_v55, 2  ;;  %v962_v63 = vrot.slane %v954_v56, 1  ;;  %v2123_v0 = vmul.f32 0.73333335, %v2097_v32 }
 0x12b   : > { %v1004_v1 = vsel %vm473_vm7, %v1003_v54, %v1002_v61  ;;  %v965_v2 = vrot.slane %v956_v59, 7  ;;  %v2127_v3 = vmul.f32 0.73333335, %v2086_v23  ;;  %v762_v4 = vmul.f32 0.26666665, %v2074_v15 }
 0x12c   : > { %1005 = vrot.lane.b32.xlu1 %v1004_v1, %s1849_s12  ;;  %v963_v5 = vsel %vm467_vm5, %v962_v63, %v961_v62  ;;  %v763_v6 = vmul.f32 0.26666665, %v2069_v11  ;;  %v764_v8 = vmul.f32 0.26666665, %v2097_v32  ;;  %v765_v9 = vmul.f32 0.26666665, %v2086_v23 }
 0x12d   : > { %v964_v10 = vsel %vm470_vm6, %v955_v58, %v963_v5  ;;  %v770_v12 = vrot.slane %v2119_v60, 1  ;;  %v772_v13 = vrot.slane %v2123_v0, 1  ;;  %v773_v14 = vrot.slane %v2127_v3, 1 }
 0x12e   : > { %v966_v17 = vsel %vm473_vm7, %v965_v2, %v964_v10  ;;  %v779_v19 = vadd.f32 %v771_v27, %v763_v6  ;;  %v680_v20 = vmul.f32 0.19999999, %v2074_v15  ;;  %v681_v21 = vmul.f32 0.19999999, %v2069_v11 }
 0x12f   : > { %967 = vrot.lane.b32.xlu0 %v966_v17, %s1850_s29  ;;  %v778_v22 = vadd.f32 %v770_v12, %v762_v4  ;;  %v780_v25 = vadd.f32 %v772_v13, %v764_v8  ;;  %v781_v26 = vadd.f32 %v773_v14, %v765_v9  ;;  %v682_v28 = vmul.f32 0.19999999, %v2097_v32 }
 0x130   : > { %v787_v29 = vrot.slane %v779_v19, 6  ;;  %v683_v30 = vmul.f32 0.19999999, %v2086_v23  ;;  %v2146_v31 = vmul.f32 0.8, %v2074_v15  ;;  %v532_v27 = vrot.slane %v2089_v24, 1 }
 0x131   : > { %v786_v33 = vrot.slane %v778_v22, 7  ;;  %v789_v34 = vrot.slane %v780_v25, 5  ;;  %v791_v36 = vrot.slane %v781_v26, 4  ;;  %v2150_v37 = vmul.f32 0.8, %v2069_v11 }
 0x132   : > { %v2153_v38 = vmul.f32 0.8, %v2097_v32  ;;  %v2156_v39 = vmul.f32 0.8, %v2086_v23  ;;  %v692_v40 = vrot.slane %v2146_v31, 1  ;;  %v533_v41 = vrot.slane %v2077_v16, 1 }
 0x133   : > { %v788_v42 = vsel %vm467_vm5, %v787_v29, %v786_v33  ;;  %v693_v44 = vrot.slane %v2150_v37, 1  ;;  %v480_v45 = vmul.f32 0.5333333, %v2074_v15  ;;  %v481_v46 = vmul.f32 0.5333333, %v2069_v11 }
 0x134   : > { %v790_v47 = vsel %vm470_vm6, %v789_v34, %v788_v42  ;;  %v694_v48 = vrot.slane %v2153_v38, 1  ;;  %v695_v49 = vrot.slane %v2156_v39, 1  ;;  %v700_v50 = vadd.f32 %v692_v40, %v680_v20 }
 0x135   : > { %v792_v51 = vsel %vm473_vm7, %v791_v36, %v790_v47  ;;  %v701_v52 = vadd.f32 %v693_v44, %v681_v21  ;;  %v482_v53 = vmul.f32 0.5333333, %v2097_v32  ;;  %v483_v54 = vmul.f32 0.5333333, %v2086_v23 }
 0x136   : > { %793 = vrot.lane.b32.xlu1 %v792_v51, %s1847_s22  ;;  %v702_v55 = vadd.f32 %v694_v48, %v682_v28  ;;  %v703_v56 = vadd.f32 %v695_v49, %v683_v30  ;;  %v708_v57 = vrot.slane %v700_v50, 6  ;;  %v484_v58 = vmul.f32 0.46666667, %v2074_v15 }
 0x137   : > { %v709_v59 = vrot.slane %v701_v52, 5  ;;  %v485_v61 = vmul.f32 0.46666667, %v2069_v11  ;;  %v486_v62 = vmul.f32 0.46666667, %v2097_v32  ;;  %v534_v63 = vrot.slane %v2107_v43, 1 }
 0x138   : > { %v711_v1 = vrot.slane %v702_v55, 4  ;;  %v713_v2 = vrot.slane %v703_v56, 3  ;;  %v487_v4 = vmul.f32 0.46666667, %v2086_v23  ;;  %v492_v5 = vrot.slane %v484_v58, 1 }
 0x139   : > { %v710_v6 = vsel %vm467_vm5, %v709_v59, %v708_v57  ;;  %v493_v8 = vrot.slane %v485_v61, 1  ;;  %v494_v9 = vrot.slane %v486_v62, 1  ;;  %v726_v10 = vmul.f32 0.26666668, %v2074_v15 }
 0x13a   : > { %v712_v12 = vsel %vm470_vm6, %v711_v1, %v710_v6  ;;  %v495_v13 = vrot.slane %v487_v4, 1  ;;  %v500_v14 = vadd.f32 %v492_v5, %v480_v45  ;;  %v727_v17 = vmul.f32 0.26666668, %v2069_v11 }
 0x13b   : > { %v714_v19 = vsel %vm473_vm7, %v713_v2, %v712_v12  ;;  %v501_v43 = vadd.f32 %v493_v8, %v481_v46  ;;  %v502_v20 = vadd.f32 %v494_v9, %v482_v53  ;;  %v728_v21 = vmul.f32 0.26666668, %v2097_v32 }
 0x13c   : > { %715 = vrot.lane.b32.xlu0 %v714_v19, %s1849_s12  ;;  %v503_v22 = vadd.f32 %v495_v13, %v483_v54  ;;  %v508_v25 = vrot.slane %v500_v14, 4  ;;  %v729_v26 = vmul.f32 0.26666668, %v2086_v23  ;;  %v734_v28 = vrot.slane %v726_v10, 1  ;;  %s1865_s12 = smov [#allocation9]  }
 0x13d   : > { %v509_v29 = vrot.slane %v501_v43, 3  ;;  %v511_v30 = vrot.slane %v502_v20, 2  ;;  %v735_v33 = vrot.slane %v727_v17, 1  ;;  %v736_v34 = vrot.slane %v728_v21, 1 }
 0x13e   : > { %v513_v36 = vrot.slane %v503_v22, 1  ;;  %v737_v40 = vrot.slane %v729_v26, 1  ;;  %v742_v42 = vadd.f32 %v734_v28, %v2119_v60  ;;  %v520_v44 = vmul.f32 0.06666666, %v2074_v15 }
 0x13f   : > { %v510_v45 = vsel %vm467_vm5, %v509_v29, %v508_v25  ;;  %v743_v46 = vadd.f32 %v735_v33, %v2081_v18  ;;  %v744_v47 = vadd.f32 %v736_v34, %v2123_v0  ;;  %v521_v48 = vmul.f32 0.06666666, %v2069_v11 }
 0x140   : > { %v512_v49 = vsel %vm470_vm6, %v511_v30, %v510_v45  ;;  %v745_v50 = vadd.f32 %v737_v40, %v2127_v3  ;;  %v750_v51 = vrot.slane %v742_v42, 7  ;;  %v522_v52 = vmul.f32 0.06666666, %v2097_v32 }
 0x141   : > { %v514_v53 = vsel %vm473_vm7, %v513_v36, %v512_v49  ;;  %v751_v60 = vrot.slane %v743_v46, 6  ;;  %v753_v54 = vrot.slane %v744_v47, 5  ;;  %v523_v55 = vmul.f32 0.06666666, %v2086_v23 }
 0x142   : > { %515 = vrot.lane.b32.xlu1 %v514_v53, %s1851_s8  ;;  %v755_v18 = vrot.slane %v745_v50, 4  ;;  %v535_v0 = vrot.slane %v2100_v35, 1  ;;  %v540_v56 = vadd.f32 %v532_v27, %v520_v44  ;;  %v541_v3 = vadd.f32 %v533_v41, %v521_v48 }
 0x143   : > { %v752_v57 = vsel %vm467_vm5, %v751_v60, %v750_v51  ;;  %v542_v58 = vadd.f32 %v534_v63, %v522_v52  ;;  %v797_v59 = vmul.f32 0.2, %v2074_v15  ;;  %v798_v61 = vmul.f32 0.2, %v2069_v11 }
 0x144   : > { %v754_v62 = vsel %vm470_vm6, %v753_v54, %v752_v57  ;;  %v543_v1 = vadd.f32 %v535_v0, %v523_v55  ;;  %v548_v2 = vrot.slane %v540_v56, 4  ;;  %v549_v4 = vrot.slane %v541_v3, 3 }
 0x145   : > { %v756_v35 = vsel %vm473_vm7, %v755_v18, %v754_v62  ;;  %v551_v5 = vrot.slane %v542_v58, 2  ;;  %v799_v24 = vmul.f32 0.2, %v2097_v32  ;;  %v800_v16 = vmul.f32 0.2, %v2086_v23 }
 0x146   : > { %757 = vrot.lane.b32.xlu0 %v756_v35, %s1852_s11  ;;  %v550_v27 = vsel %vm467_vm5, %v549_v4, %v548_v2  ;;  %v553_v41 = vrot.slane %v543_v1, 1  ;;  %v805_v63 = vrot.slane %v797_v59, 1  ;;  %v806_v6 = vrot.slane %v798_v61, 1 }
 0x147   : > { %v552_v8 = vsel %vm470_vm6, %v551_v5, %v550_v27  ;;  %v807_v9 = vrot.slane %v799_v24, 1  ;;  %v808_v10 = vrot.slane %v800_v16, 1  ;;  %v2212_v12 = vmul.f32 0.6, %v2074_v15 }
 0x148   : > { %v554_v13 = vsel %vm473_vm7, %v553_v41, %v552_v8  ;;  %v813_v14 = vadd.f32 %v805_v63, %v2146_v31  ;;  %v814_v17 = vadd.f32 %v806_v6, %v2150_v37  ;;  %v2218_v19 = vmul.f32 0.6, %v2069_v11 }
 0x149   : > { %555 = vrot.lane.b32.xlu1 %v554_v13, %s1853_s0  ;;  %v815_v43 = vadd.f32 %v807_v9, %v2153_v38  ;;  %v816_v20 = vadd.f32 %v808_v10, %v2156_v39  ;;  %v2224_v21 = vmul.f32 0.6, %v2097_v32  ;;  %v2227_v22 = vmul.f32 0.6, %v2086_v23 }
 0x14a   : > { %v821_v25 = vrot.slane %v814_v17, 7  ;;  %v564_v31 = vmul.f32 0.4, %v2074_v15  ;;  %v565_v37 = vmul.f32 0.4, %v2069_v11  ;;  %v1010_v26 = vrot.slane %v2074_v15, 3 }
 0x14b   : > { %v823_v28 = vrot.slane %v815_v43, 6  ;;  %v825_v29 = vrot.slane %v816_v20, 5  ;;  %v566_v30 = vmul.f32 0.4, %v2097_v32  ;;  %v567_v38 = vmul.f32 0.4, %v2086_v23 }
 0x14c   : > { %v822_v39 = vsel %vm467_vm5, %v821_v25, %v813_v14  ;;  %v572_v33 = vrot.slane %v564_v31, 1  ;;  %v573_v34 = vrot.slane %v565_v37, 1  ;;  %v831_v36 = vmul.f32 0.3333333, %v2074_v15 }
 0x14d   : > { %v824_v40 = vsel %vm470_vm6, %v823_v28, %v822_v39  ;;  %v574_v42 = vrot.slane %v566_v30, 1  ;;  %v575_v44 = vrot.slane %v567_v38, 1  ;;  %v832_v45 = vmul.f32 0.3333333, %v2069_v11 }
 0x14e   : > { %v826_v46 = vsel %vm473_vm7, %v825_v29, %v824_v40  ;;  %v580_v47 = vadd.f32 %v572_v33, %v2212_v12  ;;  %v581_v48 = vadd.f32 %v573_v34, %v2218_v19  ;;  %v833_v49 = vmul.f32 0.3333333, %v2097_v32 }
 0x14f   : > { %827 = vrot.lane.b32.xlu0 %v826_v46, %s1851_s8  ;;  %v582_v50 = vadd.f32 %v574_v42, %v2224_v21  ;;  %v583_v51 = vadd.f32 %v575_v44, %v2227_v22  ;;  %v834_v52 = vmul.f32 0.3333333, %v2086_v23  ;;  %v835_v53 = vmul.f32 0.6666667, %v2074_v15 }
 0x150   : > { %v588_v60 = vrot.slane %v580_v47, 5  ;;  %v589_v54 = vrot.slane %v581_v48, 4  ;;  %v836_v55 = vmul.f32 0.6666667, %v2069_v11  ;;  %v837_v18 = vmul.f32 0.6666667, %v2097_v32 }
 0x151   : > { %v591_v0 = vrot.slane %v582_v50, 3  ;;  %v593_v56 = vrot.slane %v583_v51, 2  ;;  %v838_v3 = vmul.f32 0.6666667, %v2086_v23  ;;  %v843_v57 = vrot.slane %v835_v53, 1 }
 0x152   : > { %v590_v58 = vsel %vm467_vm5, %v589_v54, %v588_v60  ;;  %v844_v59 = vrot.slane %v836_v55, 1  ;;  %v845_v61 = vrot.slane %v837_v18, 1  ;;  %v600_v62 = vmul.f32 0.13333333, %v2074_v15 }
 0x153   : > { %v592_v1 = vsel %vm470_vm6, %v591_v0, %v590_v58  ;;  %v846_v2 = vrot.slane %v838_v3, 1  ;;  %v851_v4 = vadd.f32 %v843_v57, %v831_v36  ;;  %v601_v35 = vmul.f32 0.13333333, %v2069_v11 }
 0x154   : > { %v594_v5 = vsel %vm473_vm7, %v593_v56, %v592_v1  ;;  %v852_v24 = vadd.f32 %v844_v59, %v832_v45  ;;  %v853_v16 = vadd.f32 %v845_v61, %v833_v49  ;;  %v602_v27 = vmul.f32 0.13333333, %v2097_v32 }
 0x155   : > { %595 = vrot.lane.b32.xlu1 %v594_v5, %s1854_s15  ;;  %v854_v41 = vadd.f32 %v846_v2, %v834_v52  ;;  %v603_v63 = vmul.f32 0.13333333, %v2086_v23  ;;  %v604_v6 = vmul.f32 0.8666667, %v2074_v15  ;;  %v605_v8 = vmul.f32 0.8666667, %v2069_v11 }
 0x156   : > { %v859_v9 = vrot.slane %v852_v24, 7  ;;  %v861_v10 = vrot.slane %v853_v16, 6  ;;  %v606_v13 = vmul.f32 0.8666667, %v2097_v32  ;;  %v607_v14 = vmul.f32 0.8666667, %v2086_v23 }
 0x157   : > { %v863_v17 = vrot.slane %v854_v41, 5  ;;  %v612_v43 = vrot.slane %v604_v6, 1  ;;  %v613_v20 = vrot.slane %v605_v8, 1  ;;  %v869_v25 = vmul.f32 0.13333334, %v2074_v15 }
 0x158   : > { %v860_v31 = vsel %vm467_vm5, %v859_v9, %v851_v4  ;;  %v614_v37 = vrot.slane %v606_v13, 1  ;;  %v615_v28 = vrot.slane %v607_v14, 1  ;;  %v870_v29 = vmul.f32 0.13333334, %v2069_v11 }
 0x159   : > { %v862_v30 = vsel %vm470_vm6, %v861_v10, %v860_v31  ;;  %v620_v38 = vadd.f32 %v612_v43, %v600_v62  ;;  %v621_v39 = vadd.f32 %v613_v20, %v601_v35  ;;  %v871_v33 = vmul.f32 0.13333334, %v2097_v32 }
 0x15a   : > { %v864_v34 = vsel %vm473_vm7, %v863_v17, %v862_v30  ;;  %v622_v36 = vadd.f32 %v614_v37, %v602_v27  ;;  %v623_v40 = vadd.f32 %v615_v28, %v603_v63  ;;  %v872_v42 = vmul.f32 0.13333334, %v2086_v23 }
 0x15b   : > { %865 = vrot.lane.b32.xlu0 %v864_v34, %s1853_s0  ;;  %v628_v44 = vrot.slane %v620_v38, 5  ;;  %v629_v45 = vrot.slane %v621_v39, 4  ;;  %v877_v46 = vrot.slane %v869_v25, 1  ;;  %v878_v47 = vrot.slane %v870_v29, 1 }
 0x15c   : > { %v631_v48 = vrot.slane %v622_v36, 3  ;;  %v879_v49 = vrot.slane %v871_v33, 1  ;;  %v880_v50 = vrot.slane %v872_v42, 1  ;;  %v633_v52 = vrot.slane %v623_v40, 2 }
 0x15d   : > { %v630_v51 = vsel %vm467_vm5, %v629_v45, %v628_v44  ;;  %v885_v53 = vadd.f32 %v877_v46, %v604_v6  ;;  %v1011_v60 = vrot.slane %v2069_v11, 2  ;;  %v1013_v0 = vrot.slane %v2097_v32, 1 }
 0x15e   : > { %v632_v54 = vsel %vm470_vm6, %v631_v48, %v630_v51  ;;  %v887_v55 = vadd.f32 %v879_v49, %v606_v13  ;;  %v888_v18 = vadd.f32 %v880_v50, %v607_v14  ;;  %v886_v3 = vadd.f32 %v878_v47, %v605_v8 }
 0x15f   : > { %v634_v56 = vsel %vm473_vm7, %v633_v52, %v632_v54  ;;  %v893_v57 = vrot.slane %v885_v53, 1  ;;  %v1012_v58 = vsel %vm467_vm5, %v1011_v60, %v1010_v26  ;;  %v903_v1 = vmul.f32 0.39999998, %v2074_v15 }
 0x160   : > { %635 = vrot.lane.b32.xlu1 %v634_v56, %s1855_s17  ;;  %v895_v59 = vrot.slane %v887_v55, 7  ;;  %v897_v61 = vrot.slane %v888_v18, 6  ;;  %v1014_v62 = vsel %vm470_vm6, %v1013_v0, %v1012_v58  ;;  %v905_v4 = vmul.f32 0.39999998, %v2097_v32 }
 0x161   : > { %v894_v2 = vsel %vm467_vm5, %v886_v3, %v893_v57  ;;  %v906_v35 = vmul.f32 0.39999998, %v2086_v23  ;;  %v911_v5 = vrot.slane %v2212_v12, 1  ;;  %v912_v26 = vrot.slane %v2218_v19, 1 }
 0x162   : > { %v896_v24 = vsel %vm470_vm6, %v895_v59, %v894_v2  ;;  %v913_v16 = vrot.slane %v2224_v21, 1  ;;  %v914_v27 = vrot.slane %v2227_v22, 1  ;;  %v1015_v63 = vsel %vm473_vm7, %v2086_v23, %v1014_v62 }
 0x163   : > { %v898_v41 = vsel %vm473_vm7, %v897_v61, %v896_v24  ;;  %v904_v6 = vmul.f32 0.39999998, %v2069_v11  ;;  %v919_v8 = vadd.f32 %v911_v5, %v903_v1  ;;  %v640_v19 = vmul.f32 0.6666666, %v2074_v15 }
 0x164   : > { %899 = vrot.lane.b32.xlu0 %v898_v41, %s1854_s15  ;;  %1016 = vrot.lane.b32.xlu1 %v1015_v63, %s1852_s11  ;;  %v921_v12 = vadd.f32 %v913_v16, %v905_v4  ;;  %v922_v9 = vadd.f32 %v914_v27, %v906_v35  ;;  %v641_v22 = vmul.f32 0.6666666, %v2069_v11  ;;  %v644_v13 = vmul.f32 0.33333334, %v2074_v15  ;;  %v1166_v4 = vld [vmem:[%s2577_s4] sm:$0xf] }
 0x165   : > { %v920_v10 = vadd.f32 %v912_v26, %v904_v6  ;;  %v927_v21 = vrot.slane %v919_v8, 1  ;;  %v645_v17 = vmul.f32 0.33333334, %v2069_v11  ;;  %v646_v43 = vmul.f32 0.33333334, %v2097_v32 }
 0x166   : > { %v929_v14 = vrot.slane %v921_v12, 7  ;;  %v931_v25 = vrot.slane %v922_v9, 6  ;;  %v647_v31 = vmul.f32 0.33333334, %v2086_v23  ;;  %v652_v37 = vrot.slane %v644_v13, 1 }
 0x167   : > { %v928_v20 = vsel %vm467_vm5, %v920_v10, %v927_v21  ;;  %v642_v29 = vmul.f32 0.6666666, %v2097_v32  ;;  %v653_v30 = vrot.slane %v645_v17, 1  ;;  %v654_v38 = vrot.slane %v646_v43, 1 }
 0x168   : > { %v930_v28 = vsel %vm470_vm6, %v929_v14, %v928_v20  ;;  %v643_v15 = vmul.f32 0.6666666, %v2086_v23  ;;  %v655_v33 = vrot.slane %v647_v31, 1  ;;  %v660_v11 = vadd.f32 %v652_v37, %v640_v19 }
 0x169   : > { %v932_v39 = vsel %vm473_vm7, %v931_v25, %v930_v28  ;;  %v661_v34 = vadd.f32 %v653_v30, %v641_v22  ;;  %v662_v36 = vadd.f32 %v654_v38, %v642_v29  ;;  %v1863_v2 = vmov 0  }
 0x16a   : > { %933 = vrot.lane.b32.xlu0 %v932_v39, %s1855_s17  ;;  %v663_v40 = vadd.f32 %v655_v33, %v643_v15  ;;  %v668_v42 = vrot.slane %v660_v11, 6  ;;  %1712 = vset.pattern.permute.xlu1 %v1863_v2  ;;  %v1020_v63 = vlaneseq }
 0x16b   : > { %v669_v44 = vrot.slane %v661_v34, 5  ;;  %v671_v45 = vrot.slane %v662_v36, 4  ;;  %1711 = vset.pattern.permute.xlu0 %v1863_v2 }
 0x16c   : > { %v673_v47 = vrot.slane %v663_v40, 3  ;;  %v1021_v12 = vand.u32 127, %v1020_v63 }
 0x16d   : > { %v670_v46 = vsel %vm467_vm5, %v669_v44, %v668_v42 }
 0x16e   : > { %v672_v32 = vsel %vm470_vm6, %v671_v45, %v670_v46  ;;  %v1022_v10 = vadd.s32 128, %v1021_v12  ;;  %v1027_v17 = vand.u32 15, %v1021_v12 }
 0x16f   : > { %v674_v48 = vsel %vm473_vm7, %v673_v47, %v672_v32  ;;  %vm1161_vm7 = vcmask 777216  }
 0x170   : > { %675 = vrot.lane.b32.xlu0 %v674_v48, %s1850_s29  ;;  %v1034_v13 = vand.u32 15, %v1022_v10  ;;  %vm2370_vm6 = vcmp.lt.s32.totalorder %v1027_v17, 15 }
 0x172   : > { %vm2366_vm5 = vcmp.lt.s32.totalorder %v1034_v13, 15 }
 0x19a   : > { %v476_v23 = vpop.permute.xlu1 %475 }
 0x19b   : > { %479 = vst.msk [vmem:[#allocation2] sm:$0xf0] %vm478_vm8, %v476_v23 }
 0x19e   : > { %v1006_v49 = vpop.permute.xlu1 %1005 }
 0x19f   : > { %1009 = vst.msk [vmem:[#allocation2 + $0x10] sm:$0xf0] %vm720_vm9, %v1006_v49 }
 0x1a1   : > { %v968_v50 = vpop.permute.xlu0 %967 }
 0x1a8   : > { %v794_v51 = vpop.permute.xlu1 %793 }
 0x1ae   : > { %v716_v52 = vpop.permute.xlu0 %715 }
 0x1af   : > { %721 = vst.msk [vmem:[#allocation2 + $0x8] sm:$0xf0] %vm720_vm9, %v716_v52  ;;  %vm2381_vm9 = vcmp.ge.s32.totalorder %v1034_v13, 1 }
 0x1b4   : > { %v516_v53 = vpop.permute.xlu1 %515 }
 0x1b5   : > { %519 = vst.msk [vmem:[#allocation2] sm:$0xf0] %vm518_vm10, %v516_v53 }
 0x1b8   : > { %v758_v60 = vpop.permute.xlu0 %757 }
 0x1b9   : > { %761 = vst.msk [vmem:[#allocation2 + $0x8] sm:$0xf0] %vm760_vm11, %v758_v60 }
 0x1ba   : > { %796 = vst.msk [vmem:[#allocation2 + $0x8] sm:$0xf0] %vm478_vm8, %v794_v51  ;;  %vm1113_vm8 = vcmask 785408  }
 0x1bb   : > { %v556_v54 = vpop.permute.xlu1 %555 }
 0x1bc   : > { %559 = vst.msk [vmem:[#allocation2] sm:$0xf0] %vm558_vm12, %v556_v54  ;;  %v1051_v54 = vld [vmem:[%s2576_s3] sm:$0xf] }
 0x1c1   : > { %v828_v55 = vpop.permute.xlu0 %827 }
 0x1c2   : > { %830 = vst.msk [vmem:[#allocation2 + $0x8] sm:$0xf0] %vm518_vm10, %v828_v55  ;;  %vm1100_vm10 = vcmask 900096  }
 0x1c7   : > { %v596_v18 = vpop.permute.xlu1 %595 }
 0x1c8   : > { %599 = vst.msk [vmem:[#allocation2] sm:$0xf0] %vm598_vm13, %v596_v18 }
 0x1cd   : > { %v866_v0 = vpop.permute.xlu0 %865 }
 0x1ce   : > { %868 = vst.msk [vmem:[#allocation2 + $0x8] sm:$0xf0] %vm558_vm12, %v866_v0  ;;  %vm2588_vm12 = vcmask 908288  }
 0x1d2   : > { %v636_v56 = vpop.permute.xlu1 %635 }
 0x1d3   : > { %639 = vst.msk [vmem:[#allocation2] sm:$0xf0] %vm638_vm14, %v636_v56 }
 0x1d6   : > { %v900_v3 = vpop.permute.xlu0 %899  ;;  %v1017_v57 = vpop.permute.xlu1 %1016 }
 0x1d7   : > { %902 = vst.msk [vmem:[#allocation2 + $0x8] sm:$0xf0] %vm598_vm13, %v900_v3  ;;  %vm1087_vm13 = vcmask 916480  }
 0x1d8   : > { %1019 = vst.msk [vmem:[#allocation2 + $0x10] sm:$0xf0] %vm760_vm11, %v1017_v57  ;;  %vm2386_vm11 = vcmp.ge.s32.totalorder %v1027_v17, 1 }
 0x1dc   : > { %v934_v58 = vpop.permute.xlu0 %933 }
 0x1dd   : > { %936 = vst.msk [vmem:[#allocation2 + $0x8] sm:$0xf0] %vm638_vm14, %v934_v58  ;;  %vm2586_vm14 = vcmask 1031168  }
 0x1de   : > { %970 = vst.msk [vmem:[#allocation2 + $0x8] sm:$0xf0] %vm678_vm15, %v968_v50 }
 0x1df   : > { %v1060_v59 = vld [vmem:[#allocation2 + $0x10] sm:$0xff]  ;;  %1008 = vst.msk [vmem:[#allocation2 + $0x8] sm:$0xf0] %vm718_vm0, %v1006_v49 }
 0x1e0   : > { %1159 = vrot.lane.b32.xlu0 %v1060_v59, %s1856_s19  ;;  %1124 = vrot.lane.b32.xlu1 %v1060_v59, %s1857_s21 }
 0x1e2   : > { %v676_v61 = vpop.permute.xlu0 %675 }
 0x1e3   : > { %679 = vst.msk [vmem:[#allocation2] sm:$0xf0] %vm678_vm15, %v676_v61  ;;  %vm2587_vm15 = vcmask 1039360  }
 0x1e4   : > { %1098 = vrot.lane.b32.xlu0 %v1060_v59, %s1858_s16  ;;  %1111 = vrot.lane.b32.xlu1 %v1060_v59, %s1859_s20  ;;  %719 = vst.msk [vmem:[#allocation2] sm:$0xf0] %vm718_vm0, %v716_v52  ;;  %vm1172_vm0 = vcmask 588800  }
 0x1e6   : > { %v2342_v1 = vld [vmem:[#allocation2 + $0x8] sm:$0xff] }
 0x1e8   : > { %1085 = vrot.lane.b32.xlu0 %v1060_v59, %s1860_s10  ;;  %1148 = vrot.lane.b32.xlu1 %v1060_v59, %s1861_s23 }
 0x1eb   : > { %v2326_v62 = vld [vmem:[#allocation2] sm:$0xff] }
 0x1ec   : > { %1072 = vrot.lane.b32.xlu1 %v1060_v59, %s1862_s18  ;;  %1120 = vrot.lane.b32.xlu0 %v2326_v62, %s1857_s21 }
 0x1f0   : > { %1155 = vrot.lane.b32.xlu1 %v2326_v62, %s1856_s19  ;;  %1107 = vrot.lane.b32.xlu0 %v2326_v62, %s1859_s20 }
 0x1f4   : > { %1094 = vrot.lane.b32.xlu1 %v2326_v62, %s1858_s16  ;;  %1144 = vrot.lane.b32.xlu0 %v2326_v62, %s1861_s23 }
 0x1f8   : > { %1081 = vrot.lane.b32.xlu1 %v2326_v62, %s1860_s10  ;;  %1068 = vrot.lane.b32.xlu0 %v2326_v62, %s1862_s18 }
 0x1fc   : > { %1157 = vrot.lane.b32.xlu1 %v2342_v1, %s1856_s19  ;;  %1122 = vrot.lane.b32.xlu0 %v2342_v1, %s1857_s21 }
 0x200   : > { %1096 = vrot.lane.b32.xlu1 %v2342_v1, %s1858_s16  ;;  %1109 = vrot.lane.b32.xlu0 %v2342_v1, %s1859_s20 }
 0x204   : > { %1083 = vrot.lane.b32.xlu1 %v2342_v1, %s1860_s10  ;;  %1146 = vrot.lane.b32.xlu0 %v2342_v1, %s1861_s23 }
 0x208   : > { %1135 = vrot.lane.b32.xlu1 %v2342_v1, %s1864_s9  ;;  %1070 = vrot.lane.b32.xlu0 %v2342_v1, %s1862_s18 }
 0x20c   : > { %1133 = vrot.lane.b32.xlu1 %v2326_v62, %s1864_s9  ;;  %1137 = vrot.lane.b32.xlu0 %v1060_v59, %s1864_s9 }
 0x210   : > { %1169 = vperm.xlu0 %1711, %v1166_v4  }
 0x252   : > { %v1160_v35 = vpop.permute.xlu0 %1159  ;;  %v1125_v5 = vpop.permute.xlu1 %1124 }
 0x256   : > { %v1099_v24 = vpop.permute.xlu0 %1098  ;;  %v1112_v26 = vpop.permute.xlu1 %1111 }
 0x25a   : > { %v1086_v16 = vpop.permute.xlu0 %1085  ;;  %v1149_v27 = vpop.permute.xlu1 %1148 }
 0x25e   : > { %v1073_v41 = vpop.permute.xlu1 %1072  ;;  %v1121_v6 = vpop.permute.xlu0 %1120 }
 0x262   : > { %v1156_v8 = vpop.permute.xlu1 %1155  ;;  %v1108_v9 = vpop.permute.xlu0 %1107 }
 0x266   : > { %v1095_v19 = vpop.permute.xlu1 %1094  ;;  %v1145_v21 = vpop.permute.xlu0 %1144 }
 0x26a   : > { %v1082_v22 = vpop.permute.xlu1 %1081  ;;  %v1069_v14 = vpop.permute.xlu0 %1068 }
 0x26e   : > { %v1158_v43 = vpop.permute.xlu1 %1157  ;;  %v1123_v25 = vpop.permute.xlu0 %1122 }
 0x26f   : > { %v1128_v37 = vsel %vm1126_vm2, %v1123_v25, %v1125_v5  ;;  %v1127_v28 = vsel %vm1126_vm2, %v1121_v6, %v1123_v25  ;;  %v1163_v30 = vsel %vm1161_vm7, %v1158_v43, %v1160_v35  ;;  %v1162_v15 = vsel %vm1161_vm7, %v1156_v8, %v1158_v43 }
 0x270   : > { %1603 = vmatprep.subr.msk.mxu1 %vm2366_vm5, %v1128_v37 }
 0x271   : > { %1604 = vmatpush1.msk.msra.mxu1 %vm2370_vm6, %v1127_v28 }
 0x272   : > { %v1097_v29 = vpop.permute.xlu1 %1096  ;;  %1192 = vmatprep.subr.mxu1 %v1163_v30  ;;  %v1110_v39 = vpop.permute.xlu0 %1109 }
 0x273   : > { %v1114_v11 = vsel %vm1113_vm8, %v1108_v9, %v1110_v39  ;;  %v1115_v34 = vsel %vm1113_vm8, %v1110_v39, %v1112_v26  ;;  %1193 = vmatpush1.msra.mxu1 %v1162_v15  ;;  %v1102_v40 = vsel %vm1100_vm10, %v1097_v29, %v1099_v24  ;;  %v1101_v42 = vsel %vm1100_vm10, %v1095_v19, %v1097_v29  ;;  %v1384_v24 = vld [vmem:[%s2579_s6] sm:$0xf] }
 0x274   : > { %1605 = vmatprep.subr.msk.mxu1 %vm2381_vm9, %v1115_v34 }
 0x275   : > { %1606 = vmatpush1.msk.msra.mxu1 %vm2386_vm11, %v1114_v11 }
 0x276   : > { %v1084_v36 = vpop.permute.xlu1 %1083  ;;  %1607 = vmatprep.subr.msk.mxu1 %vm2366_vm5, %v1102_v40  ;;  %v1147_v44 = vpop.permute.xlu0 %1146 }
 0x277   : > { %1608 = vmatpush1.msk.msra.mxu1 %vm2370_vm6, %v1101_v42  ;;  %v1152_v45 = vsel %vm2588_vm12, %v1147_v44, %v1149_v27  ;;  %v1151_v46 = vsel %vm2588_vm12, %v1145_v21, %v1147_v44  ;;  %v1089_v32 = vsel %vm1087_vm13, %v1084_v36, %v1086_v16  ;;  %v1088_v48 = vsel %vm1087_vm13, %v1082_v22, %v1084_v36 }
 0x278   : > { %1198 = vmatprep.subr.mxu1 %v1152_v45 }
 0x279   : > { %1199 = vmatpush1.msra.mxu1 %v1151_v46 }
 0x27a   : > { %v1136_v47 = vpop.permute.xlu1 %1135  ;;  %1609 = vmatprep.subr.msk.mxu1 %vm2381_vm9, %v1089_v32  ;;  %v1071_v23 = vpop.permute.xlu0 %1070 }
 0x27b   : > { %v1075_v49 = vsel %vm2586_vm14, %v1069_v14, %v1071_v23  ;;  %v1076_v50 = vsel %vm2586_vm14, %v1071_v23, %v1073_v41  ;;  %1610 = vmatpush1.msk.msra.mxu1 %vm2386_vm11, %v1088_v48  ;;  %vm341_vm14 = vcmask 273544  }
 0x27c   : > { %1611 = vmatprep.subr.msk.mxu1 %vm2366_vm5, %v1076_v50  ;;  %342 = vst.msk [vmem:[#allocation3 + $0x8] sm:$0xf] %vm341_vm14, %v1848_v7 }
 0x27d   : > { %1612 = vmatpush1.msk.msra.mxu1 %vm2370_vm6, %v1075_v49 }
 0x27e   : > { %v1134_v51 = vpop.permute.xlu1 %1133  ;;  %v1138_v52 = vpop.permute.xlu0 %1137 }
 0x27f   : > { %v1140_v53 = vsel %vm2587_vm15, %v1134_v51, %v1136_v47  ;;  %v1141_v60 = vsel %vm2587_vm15, %v1136_v47, %v1138_v52  ;;  %vm1258_vm15 = vcmask 1047556  }
 0x280   : > { %1204 = vmatprep.subr.mxu1 %v1141_v60  ;;  %vm1259_vm12 = vmor %vm1258_vm15, %vm354_vm4 }
 0x281   : > { %1205 = vmatpush1.msra.mxu1 %v1140_v53 }
 0x282   : > { %1613 = vmatprep.subr.msk.mxu1 %vm2381_vm9, %v2342_v1 }
 0x283   : > { %1614 = vmatpush1.msk.msra.mxu1 %vm2386_vm11, %v2326_v62 }
 0x284   : > { %1615 = vmatmul.mubr.msk.f32.vlgmr.msra.gmra.mxu1 %vm1172_vm0, %v1051_v54 }
 0x28b   : > { %v1170_v55 = vpop.permute.xlu0 %1169 }
 0x344   : > { %v1242_v18 = vpop.f32.mrf.mxu1 }
 0x345   : > { %v1243_v0 = vadd.f32 %v1242_v18, %v1170_v55 }
 0x346   : > { %v1244_v56 = vpop.f32.mrf.mxu1 }
 0x347   : > { %v1245_v3 = vadd.f32 %v1244_v56, %v1170_v55  ;;  %v1247_v57 = vmax.f32 %v1243_v0, 0.0 }
 0x349   : > { %v1248_v58 = vmax.f32 %v1245_v3, 0.0 }
 0x34b   : > { %v1251_v59 = vcombine.low %v1247_v57, %v1248_v58 }
 0x34d   : > { %1252 = vrot.lane.b32.xlu1 %v1251_v59, %s1847_s22 }
 0x3bf   : > { %v1253_v61 = vpop.permute.xlu1 %1252 }
 0x3c0   : > { %v1254_v1 = vrot.slane %v1253_v61, 4 }
 0x3c2   : > { %v1255_v62 = vsel %vm335_vm1, %v1254_v1, %v1253_v61  ;;  %1261 = vst.msk [vmem:[#allocation3 + $0x8] sm:$0xf] %vm339_vm3, %v1254_v1  ;;  %vm1375_vm1 = vcmask 1043456   ;;  %vm2610_vm3 = vcmask 908288  }
 0x3c3   : > { %1260 = vst.msk [vmem:[#allocation3] sm:$0xff] %vm1259_vm12, %v1255_v62  ;;  %vm2611_vm4 = vmmov %vm2610_vm3 }
 0x3c9   : > { %v1269_v7 = vld [vmem:[#allocation3 + $0x8] sm:$0xf] }
 0x3ca   : > { %1287 = vrot.lane.b32.xlu1 %v1269_v7, %s1860_s10  ;;  %1323 = vrot.lane.b32.xlu0 %v1269_v7, %s1857_s21  ;;  %v2438_v2 = vld [vmem:[#allocation3] sm:$0xff]  ;;  %v1332_v4 = vcombine.low %v1269_v7, %v1269_v7 }
 0x3cb   : > { %v2457_v35 = vcombine.high %v2438_v2, %v2438_v2  ;;  %v1331_v5 = vcombine.low %v2438_v2, %v2438_v2  ;;  %v1267_v31 = vsel %vm2386_vm11, %v2438_v2, 0.0 }
 0x3cd   : > { %v1268_v20 = vsel %vm2381_vm9, %v2457_v35, 0.0 }
 0x3ce   : > { %1353 = vrot.lane.b32.xlu1 %v1269_v7, %s1861_s23  ;;  %1299 = vrot.lane.b32.xlu0 %v1269_v7, %s1858_s16 }
 0x3d2   : > { %1275 = vrot.lane.b32.xlu1 %v1269_v7, %s1862_s18  ;;  %1311 = vrot.lane.b32.xlu0 %v1269_v7, %s1859_s20 }
 0x3d6   : > { %1295 = vrot.lane.b32.xlu0 %v2438_v2, %s1858_s16  ;;  %1319 = vrot.lane.b32.xlu1 %v2438_v2, %s1857_s21 }
 0x3da   : > { %1367 = vrot.lane.b32.xlu0 %v2438_v2, %s1856_s19  ;;  %1307 = vrot.lane.b32.xlu1 %v2438_v2, %s1859_s20 }
 0x3de   : > { %1349 = vrot.lane.b32.xlu0 %v2438_v2, %s1861_s23  ;;  %1283 = vrot.lane.b32.xlu1 %v2438_v2, %s1860_s10 }
 0x3e2   : > { %1335 = vrot.lane.b32.xlu0 %v2438_v2, %s1864_s9  ;;  %1369 = vrot.lane.b32.xlu1 %v1332_v4, %s1856_s19 }
 0x3e6   : > { %1285 = vrot.lane.b32.xlu0 %v2457_v35, %s1860_s10  ;;  %1321 = vrot.lane.b32.xlu1 %v2457_v35, %s1857_s21  ;;  %s334_s21 = scalar_lea.vmem [#allocation9], %s1597_s26 }
 0x3ea   : > { %1365 = vrot.lane.b32.xlu0 %v1331_v5, %s1856_s19  ;;  %1297 = vrot.lane.b32.xlu1 %v2457_v35, %s1858_s16  ;;  %s1626_s19 = sshll.u32 %s1927_s28, 7  ;;  %s1493_s16 = sshll.u32 %s334_s21, 4  ;;  %s1494_s16 = int_to_ptr.vmem [resolvable:$true] %s1493_s16 }
 0x3eb   : > { %s1777_s28 = sshll.u32 %s1865_s12, 4  ;;  %s1778_s28 = int_to_ptr.vmem [resolvable:$false] %s1777_s28 }
 0x3ec   : > { %s1779_s26 = scalar_lea.vmem %s1778_s28, 256  ;;  %p1780_p10 = scmp.lt.s32.totalorder %s1494_s16, %s1778_s28 }
 0x3ee   : > { %1351 = vrot.lane.b32.xlu0 %v2457_v35, %s1861_s23  ;;  %1309 = vrot.lane.b32.xlu1 %v2457_v35, %s1859_s20  ;;  %s1491_s23 = scalar_lea.hbm %s2580_s7, %s1626_s19 }
 0x3f2   : > { %1273 = vrot.lane.b32.xlu0 %v2457_v35, %s1862_s18  ;;  %1271 = vrot.lane.b32.xlu1 %v2438_v2, %s1862_s18  ;;  %s1479_s18 = scalar_lea.sflag [#allocation6], %s2038_s30 }
 0x3f6   : > { %1333 = vrot.lane.b32.xlu0 %v1331_v5, %s1864_s9  ;;  %1337 = vrot.lane.b32.xlu1 %v1332_v4, %s1864_s9  ;;  %s1773_s9 = scalar_lea.vmem %s1494_s16, 128 }
 0x3f7   : > { %p1774_p6 = scmp.ne.s32.totalorder %s1494_s16, %s1773_s9  ;;  %p1781_p0 = scmp.lt.s32.totalorder %s1779_s26, %s1773_s9 }
 0x3f9   : > { %p1775_p9 = pnand %p1774_p6, %p2616_p13  ;;  %p1782_p2 = por %p1781_p0, %p1780_p10 }
 0x3fa   : > { %1387 = vperm.xlu1 %1712, %v1384_v24  }
 0x3fb   : > { %p1776_p8 = pneg %p1775_p9 }
 0x3fd   : > { %p1783_p4 = pnand %p1782_p2, %p1776_p8 }
 0x43c   : > { %v1288_v26 = vpop.permute.xlu1 %1287  ;;  %v1324_v16 = vpop.permute.xlu0 %1323 }
 0x440   : > { %v1354_v27 = vpop.permute.xlu1 %1353  ;;  %v1300_v41 = vpop.permute.xlu0 %1299 }
 0x444   : > { %v1276_v63 = vpop.permute.xlu1 %1275  ;;  %v1312_v6 = vpop.permute.xlu0 %1311 }
 0x448   : > { %v1296_v8 = vpop.permute.xlu0 %1295  ;;  %v1320_v12 = vpop.permute.xlu1 %1319 }
 0x44c   : > { %v1368_v9 = vpop.permute.xlu0 %1367  ;;  %v1308_v19 = vpop.permute.xlu1 %1307 }
 0x450   : > { %v1350_v10 = vpop.permute.xlu0 %1349  ;;  %v1284_v21 = vpop.permute.xlu1 %1283 }
 0x454   : > { %v1336_v22 = vpop.permute.xlu0 %1335  ;;  %v1370_v13 = vpop.permute.xlu1 %1369 }
 0x455   : > { %v1372_v42 = vsel %vm1161_vm7, %v1368_v9, %v1370_v13 }
 0x458   : > { %v1286_v14 = vpop.permute.xlu0 %1285  ;;  %v1322_v17 = vpop.permute.xlu1 %1321 }
 0x459   : > { %v1325_v43 = vsel %vm1126_vm2, %v1320_v12, %v1322_v17  ;;  %v1326_v25 = vsel %vm1126_vm2, %v1322_v17, %v1324_v16  ;;  %v1289_v39 = vsel %vm1087_vm13, %v1284_v21, %v1286_v14  ;;  %v1290_v15 = vsel %vm1087_vm13, %v1286_v14, %v1288_v26 }
 0x45a   : > { %v1329_v37 = vsel %vm2370_vm6, %v1325_v43, 0.0  ;;  %v1330_v28 = vsel %vm2366_vm5, %v1326_v25, 0.0  ;;  %v1293_v44 = vsel %vm2386_vm11, %v1289_v39, 0.0  ;;  %v1294_v45 = vsel %vm2381_vm9, %v1290_v15, 0.0 }
 0x45b   : > { %1616 = vmatprep.subr.msk.mxu0 %vm1375_vm1, %v1330_v28  ;;  %v1345_v18 = vrot.slane %v1293_v44, 4  ;;  %v1346_v3 = vrot.slane %v1294_v45, 4  ;;  %vm2612_vm2 = vcmask 1031168  }
 0x45c   : > { %v1366_v29 = vpop.permute.xlu0 %1365  ;;  %1617 = vmatpush1.msk.msra.mxu0 %vm1375_vm1, %v1329_v37  ;;  %v1298_v30 = vpop.permute.xlu1 %1297 }
 0x45d   : > { %v1301_v11 = vsel %vm1100_vm10, %v1296_v8, %v1298_v30  ;;  %v1302_v34 = vsel %vm1100_vm10, %v1298_v30, %v1300_v41  ;;  %v1371_v32 = vsel %vm1161_vm7, %v1366_v29, %v1368_v9  ;;  %vm2613_vm7 = vmmov %vm2612_vm2 }
 0x45e   : > { %v1306_v36 = vsel %vm2366_vm5, %v1302_v34, 0.0  ;;  %v1305_v40 = vsel %vm2370_vm6, %v1301_v11, 0.0 }
 0x45f   : > { %v1362_v48 = vrot.slane %v1306_v36, 4  ;;  %v1361_v50 = vrot.slane %v1305_v40, 4 }
 0x460   : > { %v1352_v46 = vpop.permute.xlu0 %1351  ;;  %v1310_v47 = vpop.permute.xlu1 %1309 }
 0x461   : > { %v1313_v23 = vsel %vm1113_vm8, %v1308_v19, %v1310_v47  ;;  %v1314_v49 = vsel %vm1113_vm8, %v1310_v47, %v1312_v6  ;;  %v1356_v51 = vsel %vm2610_vm3, %v1352_v46, %v1354_v27  ;;  %v1355_v60 = vsel %vm2611_vm4, %v1350_v10, %v1352_v46 }
 0x462   : > { %v1317_v52 = vsel %vm2386_vm11, %v1313_v23, 0.0  ;;  %v1318_v53 = vsel %vm2381_vm9, %v1314_v49, 0.0  ;;  %v1381_v59 = vsel %vm1375_vm1, %v1356_v51, %v1362_v48  ;;  %v1380_v62 = vsel %vm1375_vm1, %v1355_v60, %v1361_v50 }
 0x463   : > { %v1383_v54 = vsel %vm1375_vm1, %v1318_v53, %v1372_v42  ;;  %v1382_v55 = vsel %vm1375_vm1, %v1317_v52, %v1371_v32  ;;  %vm2614_vm8 = vcmask 1039360  }
 0x464   : > { %v1274_v0 = vpop.permute.xlu0 %1273  ;;  %1424 = vmatprep.subr.mxu0 %v1383_v54  ;;  %v1272_v56 = vpop.permute.xlu1 %1271  ;;  %vm2615_vm10 = vmmov %vm2614_vm8 }
 0x465   : > { %v1278_v57 = vsel %vm2612_vm2, %v1274_v0, %v1276_v63  ;;  %v1277_v58 = vsel %vm2613_vm7, %v1272_v56, %v1274_v0  ;;  %1425 = vmatpush1.msra.mxu0 %v1382_v55  ;;  %v1262_v63 = vld [vmem:[%s2578_s5] sm:$0xf] }
 0x466   : > { %v1282_v61 = vsel %vm2366_vm5, %v1278_v57, 0.0  ;;  %v1281_v1 = vsel %vm2370_vm6, %v1277_v58, 0.0  ;;  %1426 = vmatprep.subr.mxu0 %v1381_v59  ;;  %vm1390_vm5 = vcmask 293888  }
 0x467   : > { %1427 = vmatpush1.msra.mxu0 %v1380_v62  ;;  %v1379_v7 = vsel %vm1375_vm1, %v1282_v61, %v1346_v3  ;;  %v1378_v4 = vsel %vm1375_vm1, %v1281_v1, %v1345_v18 }
 0x468   : > { %v1334_v5 = vpop.permute.xlu0 %1333  ;;  %1428 = vmatprep.subr.mxu0 %v1379_v7  ;;  %v1338_v24 = vpop.permute.xlu1 %1337 }
 0x469   : > { %v1339_v26 = vsel %vm2614_vm8, %v1334_v5, %v1336_v22  ;;  %v1340_v16 = vsel %vm2615_vm10, %v1336_v22, %v1338_v24  ;;  %1429 = vmatpush1.msra.mxu0 %v1378_v4 }
 0x46a   : > { %v1377_v27 = vsel %vm1375_vm1, %v1268_v20, %v1340_v16  ;;  %v1376_v41 = vsel %vm1375_vm1, %v1267_v31, %v1339_v26 }
 0x46b   : > { %1430 = vmatprep.subr.mxu0 %v1377_v27 }
 0x46c   : > { %1431 = vmatpush1.msra.mxu0 %v1376_v41 }
 0x46d   : > { %1618 = vmatmul.mubr.msk.f32.vlgmr.msra.gmra.mxu0 %vm1390_vm5, %v1262_v63 }
 0x475   : > { %v1388_v38 = vpop.permute.xlu1 %1387 }
 0x52d   : > { %v1466_v6 = vpop.f32.mrf.mxu0 }
 0x52e   : > { %v1467_v35 = vadd.f32 %v1466_v6, %v1388_v38 }
 0x52f   : > { %v1468_v8 = vpop.f32.mrf.mxu0 }
 0x530   : > { %v1469_v33 = vadd.f32 %v1468_v8, %v1388_v38  ;;  %v1471_v2 = vmax.f32 %v1467_v35, 0.0 }
 0x532   : > { %v1472_v12 = vmax.f32 %v1469_v33, 0.0 }
 0x534   : > { %v1475_v9 = vcombine.low %v1471_v2, %v1472_v12 }
 0x536   : > { %1477 = vst [vmem:[%s334_s21] sm:$0xff] %v1475_v9 }
 0x537   : > { %1786 = shalt.err (!%p1783_p4)
}
 0x538   : > { %s1787_s29 = scalar_lea.hbm %s1491_s23, 128  ;;  %s1791_s11 = scalar_lea.hbm %s2580_s7, 256 }
 0x539   : > { %p1788_p3 = scmp.ne.s32.totalorder %s1491_s23, %s1787_s29  ;;  %p1792_p12 = scmp.lt.s32.totalorder %s1491_s23, %s2580_s7 }
 0x53a   : > { %p1793_p7 = scmp.lt.s32.totalorder %s1791_s11, %s1787_s29 }
 0x53b   : > { %p1789_p5 = pnand %p1788_p3, %p2616_p13 }
 0x53c   : > { %p1794_p1 = por %p1793_p7, %p1792_p12 }
 0x53d   : > { %p1790_p11 = pneg %p1789_p5 }
 0x53f   : > { %p1795_p6 = pnand %p1794_p1, %p1790_p11 }
 0x541   : > { %1798 = shalt.err (!%p1795_p6)
}
 0x542   : > { %1644 = dma.vmem_to_hbm [thread:$0]  (%p2616_p13), %s1494_s16, 128, %s1491_s23, %s1479_s18  }
 0x543 PF: > { %s1505_s15 = sand.u32 1, %s1829_s24   ;;  %p2617_p9 = scmp.ne.s32.totalorder %s2596_s14, 0 }
 0x544   : > { %p2618_p8 = scmp.ge.s32.totalorder %s1841_s27, 2  ;;  %s1506_s17 = scalar_lea.sflag [#allocation6], %s1505_s15 }
 0x546   : > { %p1654_p10 = pnand %p2618_p8, %p2617_p9 }
 0x548   : > { %p1655_p0 = pneg %p1654_p10 }
 0x54a   : > { %1824 = dma.done.wait (%p1655_p0), %s1506_s17, 128  }
 0x54b   : > { %1826 = vsyncadd (%p1655_p0), %s1506_s17, 4294967168  ;;  %s2619_s27 = sld [smem:[#allocation14_spill]]  ;;  %s2622_s24 = smov %s1833_s25 }
 0x54c   : > { %s2620_s19 = sld [smem:[#allocation13_spill]] }
 0x54d   : > { %s2621_s26 = sld [smem:[#allocation15_spill]] }
 0x551   : > { %p23_p2 = scmp.ge.s32.totalorder %s2619_s27, 4  }
 0x552   : > { %s2623_s25 = smov %s2620_s19 }
 0x553   :  { %25 = sbr.rel (!%p23_p2) target bundleno = 9 (0x9), region = 106 }
 0x558   :  { %1511 = vsyncpa [#allocation5], 1 }
 0x559   :  { %1513 = vsyncpa [#allocation5 + $0x1], 1 }
 0x55a   :  { %1514 = vsyncpa [#allocation8], 1 }
 0x55b   :  { %1516 = vsyncpa [#allocation8 + $0x1], 1 }
 0x55c   :  { %1517 = vsyncpa [#allocation6], 1 }
 0x55d   :  { %1519 = vsyncpa [#allocation6 + $0x1], 1 }

</bundles_post_ra>
